<compile_context>
chip_gen: v5e
topology: v5e:2x2
jax: 0.10.0
libtpu: 0.0.40
codegen_flags: <defaults>
</compile_context>

<pallas_src>
import jax
import jax.numpy as jnp
from jax import lax
from jax.experimental import pallas as pl
from jax.experimental.pallas import tpu as pltpu


def _round_up(x, m):
    return (x + m - 1) // m * m


def _pick_row_tile(rows, max_tile):
    """Row tile: multiple of 128, <= max_tile, sized so the grid has >= 2 steps."""
    rows128 = _round_up(max(rows, 1), 128)
    half = _round_up((rows128 + 1) // 2, 128)
    return max(128, min(max_tile, half))


# ---------------------------------------------------------------------------
# Pallas kernels
# ---------------------------------------------------------------------------
def _conv_relu_pool_kernel(p00_ref, p01_ref, p10_ref, p11_ref, w_ref, b_ref, o_ref):
    """Fused conv (im2col matmul) + 2x2 max-pool + bias + ReLU, transposed layout.

    p??_ref : (ckk_pad, TR)    bf16  patches for the four pooling phases
    w_ref   : (c_pad, ckk_pad) bf16  zero-padded conv weights (rows = out channels)
    b_ref   : (c_pad, 1)       f32   zero-padded bias column
    o_ref   : (c_pad, TR)      bf16  pooled activations (channels on sublanes)
    """
    w = w_ref[...]
    # Four MXU pushes with W held resident; fold the pool with a running max.
    m = jnp.maximum(
        jnp.dot(w, p00_ref[...], preferred_element_type=jnp.float32),
        jnp.dot(w, p01_ref[...], preferred_element_type=jnp.float32))
    m = jnp.maximum(m, jnp.dot(w, p10_ref[...], preferred_element_type=jnp.float32))
    m = jnp.maximum(m, jnp.dot(w, p11_ref[...], preferred_element_type=jnp.float32))
    # max-before-(bias+ReLU) is valid: the per-channel bias is shared across phases.
    o_ref[...] = jnp.maximum(m + b_ref[...], 0.0).astype(o_ref.dtype)


def _mlp_kernel(x_ref, w1_ref, b1_ref, w2_ref, b2_ref, w3_ref, b3_ref, o_ref):
    """fc1 -> ReLU -> fc2 -> ReLU -> fc3, all widths zero-padded to 128 lanes."""
    h = jnp.dot(x_ref[...], w1_ref[...], preferred_element_type=jnp.float32) + b1_ref[...]
    h = jnp.maximum(h, 0.0).astype(jnp.bfloat16)
    h = jnp.dot(h, w2_ref[...], preferred_element_type=jnp.float32) + b2_ref[...]
    h = jnp.maximum(h, 0.0).astype(jnp.bfloat16)
    o_ref[...] = jnp.dot(h, w3_ref[...], preferred_element_type=jnp.float32) + b3_ref[...]


# ---------------------------------------------------------------------------
# Glue (data rearrangement / parameter plumbing in XLA)
# ---------------------------------------------------------------------------
def _im2col_t(x_cnhw, k):
    """(C, N, H, W) -> (C*k*k, N, Ho, Wo), patch-column order (c, ky, kx)."""
    c, n, h, w = x_cnhw.shape
    ho, wo = h - k + 1, w - k + 1
    cols = []
    for ci in range(c):
        for ky in range(k):
            for kx in range(k):
                cols.append(x_cnhw[ci, :, ky:ky + ho, kx:kx + wo])
    return jnp.stack(cols, axis=0)


def conv_relu_pool(x_cnhw, w_oihw, b, k=5):
    """conv(kxk, VALID) -> ReLU -> maxpool(2,2); (C,N,H,W) in, (Cout,N,Hp,Wp) bf16 out."""
    c_in, n = x_cnhw.shape[0], x_cnhw.shape[1]
    c_out = w_oihw.shape[0]
    ckk = c_in * k * k

    pt = _im2col_t(x_cnhw, k)                      # (ckk, N, Ho, Wo)
    ho, wo = pt.shape[2], pt.shape[3]
    hp, wp = ho // 2, wo // 2
    rows = n * hp * wp                             # row order: (n, i, j)

    ckk_pad = _round_up(ckk, 16)                   # 25 -> 32, 150 -> 160
    c_pad = _round_up(c_out, 16)                   # 6 -> 16, 16 -> 16 (bf16 sublane tile)

    # Double-buffered phase inputs (4 * 2 * ckk_pad * tr * 2B) kept under ~10 MiB.
    budget = 10 * 1024 * 1024
    max_tile = min(8192, max(128, (budget // (16 * ckk_pad)) // 128 * 128))
    tr = _pick_row_tile(rows, max_tile)
    rows_pad = max(_round_up(rows, tr), 2 * tr)    # >= 2 grid steps for v7x megacore

    def phase(a, bb):
        p = pt[:, :, a::2, bb::2].reshape(ckk, rows)
        p = jnp.pad(p, ((0, ckk_pad - ckk), (0, rows_pad - rows)))
        return p.astype(jnp.bfloat16)

    phases = [phase(a, bb) for a in (0, 1) for bb in (0, 1)]

    w_mat = w_oihw.reshape(c_out, ckk)             # rows = out channels
    w_mat = jnp.pad(w_mat, ((0, c_pad - c_out), (0, ckk_pad - ckk))).astype(jnp.bfloat16)
    b_col = jnp.pad(b.astype(jnp.float32), (0, c_pad - c_out)).reshape(c_pad, 1)

    out = pl.pallas_call(
        _conv_relu_pool_kernel,
        out_shape=jax.ShapeDtypeStruct((c_pad, rows_pad), jnp.bfloat16),
        grid=(rows_pad // tr,),
        in_specs=[pl.BlockSpec((ckk_pad, tr), lambda i: (0, i)) for _ in range(4)]
                 + [pl.BlockSpec((c_pad, ckk_pad), lambda i: (0, 0)),
                    pl.BlockSpec((c_pad, 1), lambda i: (0, 0))],
        out_specs=pl.BlockSpec((c_pad, tr), lambda i: (0, i)),
        compiler_params=pltpu.CompilerParams(
            dimension_semantics=("parallel",),
            vmem_limit_bytes=32 * 1024 * 1024),
    )(*phases, w_mat, b_col)

    return out[:c_out, :rows].reshape(c_out, n, hp, wp)   # stay channel-first


def mlp(x, fw1, fb1, fw2, fb2, fw3, fb3):
    n, d_in = x.shape                              # d_in = 256 (multiple of 128)
    tn = _pick_row_tile(n, 2048)                   # multiple of 128 -> bf16-safe sublanes
    n_pad = max(_round_up(n, tn), 2 * tn)          # >= 2 grid steps for v7x megacore

    xp = jnp.pad(x.astype(jnp.bfloat16), ((0, n_pad - n), (0, 0)))

    def wt(w, din_pad, dout_pad):
        w_t = w.T
        return jnp.pad(w_t, ((0, din_pad - w_t.shape[0]),
                             (0, dout_pad - w_t.shape[1]))).astype(jnp.bfloat16)

    def brow(bv, dout_pad):
        return jnp.pad(bv.astype(jnp.float32), (0, dout_pad - bv.shape[0])).reshape(1, dout_pad)

    w1p, b1p = wt(fw1, d_in, 128), brow(fb1, 128)
    w2p, b2p = wt(fw2, 128, 128), brow(fb2, 128)
    w3p, b3p = wt(fw3, 128, 128), brow(fb3, 128)

    out = pl.pallas_call(
        _mlp_kernel,
        out_shape=jax.ShapeDtypeStruct((n_pad, 128), jnp.float32),
        grid=(n_pad // tn,),
        in_specs=[pl.BlockSpec((tn, d_in), lambda i: (i, 0)),
                  pl.BlockSpec((d_in, 128), lambda i: (0, 0)),
                  pl.BlockSpec((1, 128), lambda i: (0, 0)),
                  pl.BlockSpec((128, 128), lambda i: (0, 0)),
                  pl.BlockSpec((1, 128), lambda i: (0, 0)),
                  pl.BlockSpec((128, 128), lambda i: (0, 0)),
                  pl.BlockSpec((1, 128), lambda i: (0, 0))],
        out_specs=pl.BlockSpec((tn, 128), lambda i: (i, 0)),
        compiler_params=pltpu.CompilerParams(
            dimension_semantics=("parallel",),
            vmem_limit_bytes=32 * 1024 * 1024),
    )(xp, w1p, b1p, w2p, b2p, w3p, b3p)
    return out[:n, :fw3.shape[0]]


def femnist_cnn_forward(x, params):
    """x: (N, 1, 28, 28) float32 -> logits (N, 10)."""
    w1, b1, w2, b2, fw1, fb1, fw2, fb2, fw3, fb3 = params
    xc = jnp.transpose(x, (1, 0, 2, 3))        # (1, N, 28, 28): free-ish (C=1)
    y = conv_relu_pool(xc, w1, b1)              # (6, N, 12, 12) bf16
    y = conv_relu_pool(y, w2, b2)               # (16, N, 4, 4) bf16
    y = jnp.transpose(y, (1, 0, 2, 3)).reshape(-1, 16 * 4 * 4)  # == torch .view
    return mlp(y, fw1, fb1, fw2, fb2, fw3, fb3)


# ---------------------------------------------------------------------------
# Deterministic parameter init (PyTorch shapes / layouts)
# ---------------------------------------------------------------------------
def init_params(key):
    ks = jax.random.split(key, 10)

    def u(k, shape, fan_in):
        bound = 1.0 / (fan_in ** 0.5)
        return jax.random.uniform(k, shape, jnp.float32, -bound, bound)

    w1 = u(ks[0], (6, 1, 5, 5), 25);    b1 = u(ks[1], (6,), 25)
    w2 = u(ks[2], (16, 6, 5, 5), 150);  b2 = u(ks[3], (16,), 150)
    fw1 = u(ks[4], (120, 256), 256);    fb1 = u(ks[5], (120,), 256)
    fw2 = u(ks[6], (84, 120), 120);     fb2 = u(ks[7], (84,), 120)
    fw3 = u(ks[8], (10, 84), 84);       fb3 = u(ks[9], (10,), 84)
    return (w1, b1, w2, b2, fw1, fb1, fw2, fb2, fw3, fb3)


# ---------------------------------------------------------------------------
# Pure-JAX reference (mirrors the PyTorch forward exactly, all f32)
# ---------------------------------------------------------------------------
def reference_forward(x, params):
    w1, b1, w2, b2, fw1, fb1, fw2, fb2, fw3, fb3 = params
    dn = ('NCHW', 'OIHW', 'NCHW')
    y = lax.conv_general_dilated(x, w1, (1, 1), 'VALID', dimension_numbers=dn)
    y = jnp.maximum(y + b1[None, :, None, None], 0.0)
    y = lax.reduce_window(y, -jnp.inf, lax.max, (1, 1, 2, 2), (1, 1, 2, 2), 'VALID')
    y = lax.conv_general_dilated(y, w2, (1, 1), 'VALID', dimension_numbers=dn)
    y = jnp.maximum(y + b2[None, :, None, None], 0.0)
    y = lax.reduce_window(y, -jnp.inf, lax.max, (1, 1, 2, 2), (1, 1, 2, 2), 'VALID')
    y = y.reshape(y.shape[0], -1)
    y = jnp.maximum(y @ fw1.T + fb1, 0.0)
    y = jnp.maximum(y @ fw2.T + fb2, 0.0)
    return y @ fw3.T + fb3


if __name__ == "__main__":
    key = jax.random.PRNGKey(0)
    kx, kp = jax.random.split(key)
    # FEMNIST images: 1x28x28 (required by the 16*4*4 flatten in the module)
    x = jax.random.normal(kx, (2, 1, 28, 28), jnp.float32)
    params = init_params(kp)

    out = jax.jit(femnist_cnn_forward)(x, params)
    out = jax.block_until_ready(out)
    assert out.shape == (2, 10), out.shape

    ref = reference_forward(x, params)
    # bf16 MXU operands + bf16 conv intermediates with f32 accumulation -> small drift vs f32 ref.
    if not jnp.allclose(out, ref, atol=5e-2, rtol=5e-2):
        raise AssertionError("Pallas output does not match JAX reference")
    print("KERNEL_OK")
</pallas_src>

<mosaic_0001>
module attributes {stable_mosaic.version = 11 : i64} {
  func.func @_conv_relu_pool_kernel(%arg0: i32, %arg1: memref<32x256xbf16, #tpu.memory_space<vmem>>, %arg2: memref<32x256xbf16, #tpu.memory_space<vmem>>, %arg3: memref<32x256xbf16, #tpu.memory_space<vmem>>, %arg4: memref<32x256xbf16, #tpu.memory_space<vmem>>, %arg5: memref<16x32xbf16, #tpu.memory_space<vmem>>, %arg6: memref<16x1xf32, #tpu.memory_space<vmem>>, %arg7: memref<16x256xbf16, #tpu.memory_space<vmem>>) attributes {dimension_semantics = [#tpu.dimension_semantics<parallel>], iteration_bounds = array<i64: 2>, scalar_prefetch = 0 : i64, scratch_operands = 0 : i64, tpu.core_type = #tpu.core_type<tc>, window_params = [{transform_indices = @transform_0, window_bounds = array<i64: 32, 256>}, {transform_indices = @transform_1, window_bounds = array<i64: 32, 256>}, {transform_indices = @transform_2, window_bounds = array<i64: 32, 256>}, {transform_indices = @transform_3, window_bounds = array<i64: 32, 256>}, {pipeline_mode = #tpu.pipeline_mode<synchronous>, transform_indices = @transform_4, window_bounds = array<i64: 16, 32>}, {pipeline_mode = #tpu.pipeline_mode<synchronous>, transform_indices = @transform_5, window_bounds = array<i64: 16, 1>}, {transform_indices = @transform_6, window_bounds = array<i64: 16, 256>}]} {
    %c0 = arith.constant 0 : index
    %c0_0 = arith.constant 0 : index
    %0 = vector.load %arg5[%c0, %c0_0] : memref<16x32xbf16, #tpu.memory_space<vmem>>, vector<16x32xbf16>
    %c0_1 = arith.constant 0 : index
    %c0_2 = arith.constant 0 : index
    %1 = vector.load %arg1[%c0_1, %c0_2] : memref<32x256xbf16, #tpu.memory_space<vmem>>, vector<32x256xbf16>
    %cst = arith.constant dense<0.000000e+00> : vector<16x256xf32>
    %2 = tpu.matmul %0, %1, %cst {dimension_numbers = #tpu.dot_dimension_numbers<[1], [0], [0], [1], [0, 0, 1, 1], [], []>} : vector<16x32xbf16>, vector<32x256xbf16>, vector<16x256xf32> -> vector<16x256xf32>
    %c0_3 = arith.constant 0 : index
    %c0_4 = arith.constant 0 : index
    %3 = vector.load %arg2[%c0_3, %c0_4] : memref<32x256xbf16, #tpu.memory_space<vmem>>, vector<32x256xbf16>
    %cst_5 = arith.constant dense<0.000000e+00> : vector<16x256xf32>
    %4 = tpu.matmul %0, %3, %cst_5 {dimension_numbers = #tpu.dot_dimension_numbers<[1], [0], [0], [1], [0, 0, 1, 1], [], []>} : vector<16x32xbf16>, vector<32x256xbf16>, vector<16x256xf32> -> vector<16x256xf32>
    %5 = arith.maximumf %2, %4 : vector<16x256xf32>
    %c0_6 = arith.constant 0 : index
    %c0_7 = arith.constant 0 : index
    %6 = vector.load %arg3[%c0_6, %c0_7] : memref<32x256xbf16, #tpu.memory_space<vmem>>, vector<32x256xbf16>
    %cst_8 = arith.constant dense<0.000000e+00> : vector<16x256xf32>
    %7 = tpu.matmul %0, %6, %cst_8 {dimension_numbers = #tpu.dot_dimension_numbers<[1], [0], [0], [1], [0, 0, 1, 1], [], []>} : vector<16x32xbf16>, vector<32x256xbf16>, vector<16x256xf32> -> vector<16x256xf32>
    %8 = arith.maximumf %5, %7 : vector<16x256xf32>
    %c0_9 = arith.constant 0 : index
    %c0_10 = arith.constant 0 : index
    %9 = vector.load %arg4[%c0_9, %c0_10] : memref<32x256xbf16, #tpu.memory_space<vmem>>, vector<32x256xbf16>
    %cst_11 = arith.constant dense<0.000000e+00> : vector<16x256xf32>
    %10 = tpu.matmul %0, %9, %cst_11 {dimension_numbers = #tpu.dot_dimension_numbers<[1], [0], [0], [1], [0, 0, 1, 1], [], []>} : vector<16x32xbf16>, vector<32x256xbf16>, vector<16x256xf32> -> vector<16x256xf32>
    %11 = arith.maximumf %8, %10 : vector<16x256xf32>
    %c0_12 = arith.constant 0 : index
    %c0_13 = arith.constant 0 : index
    %12 = vector.load %arg6[%c0_12, %c0_13] : memref<16x1xf32, #tpu.memory_space<vmem>>, vector<16x1xf32>
    %13 = vector.broadcast %12 : vector<16x1xf32> to vector<16x256xf32>
    %14 = arith.addf %11, %13 : vector<16x256xf32>
    %cst_14 = arith.constant 0.000000e+00 : f32
    %15 = vector.broadcast %cst_14 : f32 to vector<16x256xf32>
    %16 = arith.maximumf %14, %15 : vector<16x256xf32>
    %17 = arith.truncf %16 : vector<16x256xf32> to vector<16x256xbf16>
    %c0_15 = arith.constant 0 : index
    %c0_16 = arith.constant 0 : index
    %18 = vector.load %arg7[%c0_15, %c0_16] : memref<16x256xbf16, #tpu.memory_space<vmem>>, vector<16x256xbf16>
    tpu.vector_store %arg7[%c0_15, %c0_16], %17 {strides = array<i32>} : memref<16x256xbf16, #tpu.memory_space<vmem>>, vector<16x256xbf16>,
    return
  }
  func.func @transform_0(%arg0: i32) -> (i32, i32) {
    %c0_i32 = arith.constant 0 : i32
    %c0_i32_0 = arith.constant 0 : i32
    return %c0_i32, %arg0 : i32, i32
  }
  func.func @transform_1(%arg0: i32) -> (i32, i32) {
    %c0_i32 = arith.constant 0 : i32
    %c0_i32_0 = arith.constant 0 : i32
    return %c0_i32, %arg0 : i32, i32
  }
  func.func @transform_2(%arg0: i32) -> (i32, i32) {
    %c0_i32 = arith.constant 0 : i32
    %c0_i32_0 = arith.constant 0 : i32
    return %c0_i32, %arg0 : i32, i32
  }
  func.func @transform_3(%arg0: i32) -> (i32, i32) {
    %c0_i32 = arith.constant 0 : i32
    %c0_i32_0 = arith.constant 0 : i32
    return %c0_i32, %arg0 : i32, i32
  }
  func.func @transform_4(%arg0: i32) -> (i32, i32) {
    %c0_i32 = arith.constant 0 : i32
    %c0_i32_0 = arith.constant 0 : i32
    %c0_i32_1 = arith.constant 0 : i32
    return %c0_i32, %c0_i32_0 : i32, i32
  }
  func.func @transform_5(%arg0: i32) -> (i32, i32) {
    %c0_i32 = arith.constant 0 : i32
    %c0_i32_0 = arith.constant 0 : i32
    %c0_i32_1 = arith.constant 0 : i32
    return %c0_i32, %c0_i32_0 : i32, i32
  }
  func.func @transform_6(%arg0: i32) -> (i32, i32) {
    %c0_i32 = arith.constant 0 : i32
    %c0_i32_0 = arith.constant 0 : i32
    return %c0_i32, %arg0 : i32, i32
  }
}

module attributes {stable_mosaic.version = 11 : i64} {
  func.func @_conv_relu_pool_kernel(%arg0: i32, %arg1: memref<160x128xbf16, #tpu.memory_space<vmem>>, %arg2: memref<160x128xbf16, #tpu.memory_space<vmem>>, %arg3: memref<160x128xbf16, #tpu.memory_space<vmem>>, %arg4: memref<160x128xbf16, #tpu.memory_space<vmem>>, %arg5: memref<16x160xbf16, #tpu.memory_space<vmem>>, %arg6: memref<16x1xf32, #tpu.memory_space<vmem>>, %arg7: memref<16x128xbf16, #tpu.memory_space<vmem>>) attributes {dimension_semantics = [#tpu.dimension_semantics<parallel>], iteration_bounds = array<i64: 2>, scalar_prefetch = 0 : i64, scratch_operands = 0 : i64, tpu.core_type = #tpu.core_type<tc>, window_params = [{transform_indices = @transform_0, window_bounds = array<i64: 160, 128>}, {transform_indices = @transform_1, window_bounds = array<i64: 160, 128>}, {transform_indices = @transform_2, window_bounds = array<i64: 160, 128>}, {transform_indices = @transform_3, window_bounds = array<i64: 160, 128>}, {pipeline_mode = #tpu.pipeline_mode<synchronous>, transform_indices = @transform_4, window_bounds = array<i64: 16, 160>}, {pipeline_mode = #tpu.pipeline_mode<synchronous>, transform_indices = @transform_5, window_bounds = array<i64: 16, 1>}, {transform_indices = @transform_6, window_bounds = array<i64: 16, 128>}]} {
    %c0 = arith.constant 0 : index
    %c0_0 = arith.constant 0 : index
    %0 = vector.load %arg5[%c0, %c0_0] : memref<16x160xbf16, #tpu.memory_space<vmem>>, vector<16x160xbf16>
    %c0_1 = arith.constant 0 : index
    %c0_2 = arith.constant 0 : index
    %1 = vector.load %arg1[%c0_1, %c0_2] : memref<160x128xbf16, #tpu.memory_space<vmem>>, vector<160x128xbf16>
    %cst = arith.constant dense<0.000000e+00> : vector<16x128xf32>
    %2 = tpu.matmul %0, %1, %cst {dimension_numbers = #tpu.dot_dimension_numbers<[1], [0], [0], [1], [0, 0, 1, 1], [], []>} : vector<16x160xbf16>, vector<160x128xbf16>, vector<16x128xf32> -> vector<16x128xf32>
    %c0_3 = arith.constant 0 : index
    %c0_4 = arith.constant 0 : index
    %3 = vector.load %arg2[%c0_3, %c0_4] : memref<160x128xbf16, #tpu.memory_space<vmem>>, vector<160x128xbf16>
    %cst_5 = arith.constant dense<0.000000e+00> : vector<16x128xf32>
    %4 = tpu.matmul %0, %3, %cst_5 {dimension_numbers = #tpu.dot_dimension_numbers<[1], [0], [0], [1], [0, 0, 1, 1], [], []>} : vector<16x160xbf16>, vector<160x128xbf16>, vector<16x128xf32> -> vector<16x128xf32>
    %5 = arith.maximumf %2, %4 : vector<16x128xf32>
    %c0_6 = arith.constant 0 : index
    %c0_7 = arith.constant 0 : index
    %6 = vector.load %arg3[%c0_6, %c0_7] : memref<160x128xbf16, #tpu.memory_space<vmem>>, vector<160x128xbf16>
    %cst_8 = arith.constant dense<0.000000e+00> : vector<16x128xf32>
    %7 = tpu.matmul %0, %6, %cst_8 {dimension_numbers = #tpu.dot_dimension_numbers<[1], [0], [0], [1], [0, 0, 1, 1], [], []>} : vector<16x160xbf16>, vector<160x128xbf16>, vector<16x128xf32> -> vector<16x128xf32>
    %8 = arith.maximumf %5, %7 : vector<16x128xf32>
    %c0_9 = arith.constant 0 : index
    %c0_10 = arith.constant 0 : index
    %9 = vector.load %arg4[%c0_9, %c0_10] : memref<160x128xbf16, #tpu.memory_space<vmem>>, vector<160x128xbf16>
    %cst_11 = arith.constant dense<0.000000e+00> : vector<16x128xf32>
    %10 = tpu.matmul %0, %9, %cst_11 {dimension_numbers = #tpu.dot_dimension_numbers<[1], [0], [0], [1], [0, 0, 1, 1], [], []>} : vector<16x160xbf16>, vector<160x128xbf16>, vector<16x128xf32> -> vector<16x128xf32>
    %11 = arith.maximumf %8, %10 : vector<16x128xf32>
    %c0_12 = arith.constant 0 : index
    %c0_13 = arith.constant 0 : index
    %12 = vector.load %arg6[%c0_12, %c0_13] : memref<16x1xf32, #tpu.memory_space<vmem>>, vector<16x1xf32>
    %13 = vector.broadcast %12 : vector<16x1xf32> to vector<16x128xf32>
    %14 = arith.addf %11, %13 : vector<16x128xf32>
    %cst_14 = arith.constant 0.000000e+00 : f32
    %15 = vector.broadcast %cst_14 : f32 to vector<16x128xf32>
    %16 = arith.maximumf %14, %15 : vector<16x128xf32>
    %17 = arith.truncf %16 : vector<16x128xf32> to vector<16x128xbf16>
    %c0_15 = arith.constant 0 : index
    %c0_16 = arith.constant 0 : index
    %18 = vector.load %arg7[%c0_15, %c0_16] : memref<16x128xbf16, #tpu.memory_space<vmem>>, vector<16x128xbf16>
    tpu.vector_store %arg7[%c0_15, %c0_16], %17 {strides = array<i32>} : memref<16x128xbf16, #tpu.memory_space<vmem>>, vector<16x128xbf16>,
    return
  }
  func.func @transform_0(%arg0: i32) -> (i32, i32) {
    %c0_i32 = arith.constant 0 : i32
    %c0_i32_0 = arith.constant 0 : i32
    return %c0_i32, %arg0 : i32, i32
  }
  func.func @transform_1(%arg0: i32) -> (i32, i32) {
    %c0_i32 = arith.constant 0 : i32
    %c0_i32_0 = arith.constant 0 : i32
    return %c0_i32, %arg0 : i32, i32
  }
  func.func @transform_2(%arg0: i32) -> (i32, i32) {
    %c0_i32 = arith.constant 0 : i32
    %c0_i32_0 = arith.constant 0 : i32
    return %c0_i32, %arg0 : i32, i32
  }
  func.func @transform_3(%arg0: i32) -> (i32, i32) {
    %c0_i32 = arith.constant 0 : i32
    %c0_i32_0 = arith.constant 0 : i32
    return %c0_i32, %arg0 : i32, i32
  }
  func.func @transform_4(%arg0: i32) -> (i32, i32) {
    %c0_i32 = arith.constant 0 : i32
    %c0_i32_0 = arith.constant 0 : i32
    %c0_i32_1 = arith.constant 0 : i32
    return %c0_i32, %c0_i32_0 : i32, i32
  }
  func.func @transform_5(%arg0: i32) -> (i32, i32) {
    %c0_i32 = arith.constant 0 : i32
    %c0_i32_0 = arith.constant 0 : i32
    %c0_i32_1 = arith.constant 0 : i32
    return %c0_i32, %c0_i32_0 : i32, i32
  }
  func.func @transform_6(%arg0: i32) -> (i32, i32) {
    %c0_i32 = arith.constant 0 : i32
    %c0_i32_0 = arith.constant 0 : i32
    return %c0_i32, %arg0 : i32, i32
  }
}

module attributes {stable_mosaic.version = 11 : i64} {
  func.func @_mlp_kernel(%arg0: i32, %arg1: memref<128x256xbf16, #tpu.memory_space<vmem>>, %arg2: memref<256x128xbf16, #tpu.memory_space<vmem>>, %arg3: memref<1x128xf32, #tpu.memory_space<vmem>>, %arg4: memref<128x128xbf16, #tpu.memory_space<vmem>>, %arg5: memref<1x128xf32, #tpu.memory_space<vmem>>, %arg6: memref<128x128xbf16, #tpu.memory_space<vmem>>, %arg7: memref<1x128xf32, #tpu.memory_space<vmem>>, %arg8: memref<128x128xf32, #tpu.memory_space<vmem>>) attributes {dimension_semantics = [#tpu.dimension_semantics<parallel>], iteration_bounds = array<i64: 2>, scalar_prefetch = 0 : i64, scratch_operands = 0 : i64, tpu.core_type = #tpu.core_type<tc>, window_params = [{transform_indices = @transform_0, window_bounds = array<i64: 128, 256>}, {pipeline_mode = #tpu.pipeline_mode<synchronous>, transform_indices = @transform_1, window_bounds = array<i64: 256, 128>}, {pipeline_mode = #tpu.pipeline_mode<synchronous>, transform_indices = @transform_2, window_bounds = array<i64: 1, 128>}, {pipeline_mode = #tpu.pipeline_mode<synchronous>, transform_indices = @transform_3, window_bounds = array<i64: 128, 128>}, {pipeline_mode = #tpu.pipeline_mode<synchronous>, transform_indices = @transform_4, window_bounds = array<i64: 1, 128>}, {pipeline_mode = #tpu.pipeline_mode<synchronous>, transform_indices = @transform_5, window_bounds = array<i64: 128, 128>}, {pipeline_mode = #tpu.pipeline_mode<synchronous>, transform_indices = @transform_6, window_bounds = array<i64: 1, 128>}, {transform_indices = @transform_7, window_bounds = array<i64: 128, 128>}]} {
    %c0 = arith.constant 0 : index
    %c0_0 = arith.constant 0 : index
    %0 = vector.load %arg1[%c0, %c0_0] : memref<128x256xbf16, #tpu.memory_space<vmem>>, vector<128x256xbf16>
    %c0_1 = arith.constant 0 : index
    %c0_2 = arith.constant 0 : index
    %1 = vector.load %arg2[%c0_1, %c0_2] : memref<256x128xbf16, #tpu.memory_space<vmem>>, vector<256x128xbf16>
    %cst = arith.constant dense<0.000000e+00> : vector<128x128xf32>
    %2 = tpu.matmul %0, %1, %cst {dimension_numbers = #tpu.dot_dimension_numbers<[1], [0], [0], [1], [0, 0, 1, 1], [], []>} : vector<128x256xbf16>, vector<256x128xbf16>, vector<128x128xf32> -> vector<128x128xf32>
    %c0_3 = arith.constant 0 : index
    %c0_4 = arith.constant 0 : index
    %3 = vector.load %arg3[%c0_3, %c0_4] : memref<1x128xf32, #tpu.memory_space<vmem>>, vector<1x128xf32>
    %4 = vector.broadcast %3 : vector<1x128xf32> to vector<128x128xf32>
    %5 = arith.addf %2, %4 : vector<128x128xf32>
    %cst_5 = arith.constant 0.000000e+00 : f32
    %6 = vector.broadcast %cst_5 : f32 to vector<128x128xf32>
    %7 = arith.maximumf %5, %6 : vector<128x128xf32>
    %8 = arith.truncf %7 : vector<128x128xf32> to vector<128x128xbf16>
    %c0_6 = arith.constant 0 : index
    %c0_7 = arith.constant 0 : index
    %9 = vector.load %arg4[%c0_6, %c0_7] : memref<128x128xbf16, #tpu.memory_space<vmem>>, vector<128x128xbf16>
    %cst_8 = arith.constant dense<0.000000e+00> : vector<128x128xf32>
    %10 = tpu.matmul %8, %9, %cst_8 {dimension_numbers = #tpu.dot_dimension_numbers<[1], [0], [0], [1], [0, 0, 1, 1], [], []>} : vector<128x128xbf16>, vector<128x128xbf16>, vector<128x128xf32> -> vector<128x128xf32>
    %c0_9 = arith.constant 0 : index
    %c0_10 = arith.constant 0 : index
    %11 = vector.load %arg5[%c0_9, %c0_10] : memref<1x128xf32, #tpu.memory_space<vmem>>, vector<1x128xf32>
    %12 = vector.broadcast %11 : vector<1x128xf32> to vector<128x128xf32>
    %13 = arith.addf %10, %12 : vector<128x128xf32>
    %cst_11 = arith.constant 0.000000e+00 : f32
    %14 = vector.broadcast %cst_11 : f32 to vector<128x128xf32>
    %15 = arith.maximumf %13, %14 : vector<128x128xf32>
    %16 = arith.truncf %15 : vector<128x128xf32> to vector<128x128xbf16>
    %c0_12 = arith.constant 0 : index
    %c0_13 = arith.constant 0 : index
    %17 = vector.load %arg6[%c0_12, %c0_13] : memref<128x128xbf16, #tpu.memory_space<vmem>>, vector<128x128xbf16>
    %cst_14 = arith.constant dense<0.000000e+00> : vector<128x128xf32>
    %18 = tpu.matmul %16, %17, %cst_14 {dimension_numbers = #tpu.dot_dimension_numbers<[1], [0], [0], [1], [0, 0, 1, 1], [], []>} : vector<128x128xbf16>, vector<128x128xbf16>, vector<128x128xf32> -> vector<128x128xf32>
    %c0_15 = arith.constant 0 : index
    %c0_16 = arith.constant 0 : index
    %19 = vector.load %arg7[%c0_15, %c0_16] : memref<1x128xf32, #tpu.memory_space<vmem>>, vector<1x128xf32>
    %20 = vector.broadcast %19 : vector<1x128xf32> to vector<128x128xf32>
    %21 = arith.addf %18, %20 : vector<128x128xf32>
    %c0_17 = arith.constant 0 : index
    %c0_18 = arith.constant 0 : index
    %22 = vector.load %arg8[%c0_17, %c0_18] : memref<128x128xf32, #tpu.memory_space<vmem>>, vector<128x128xf32>
    tpu.vector_store %arg8[%c0_17, %c0_18], %21 {strides = array<i32>} : memref<128x128xf32, #tpu.memory_space<vmem>>, vector<128x128xf32>,
    return
  }
  func.func @transform_0(%arg0: i32) -> (i32, i32) {
    %c0_i32 = arith.constant 0 : i32
    %c0_i32_0 = arith.constant 0 : i32
    return %arg0, %c0_i32 : i32, i32
  }
  func.func @transform_1(%arg0: i32) -> (i32, i32) {
    %c0_i32 = arith.constant 0 : i32
    %c0_i32_0 = arith.constant 0 : i32
    %c0_i32_1 = arith.constant 0 : i32
    return %c0_i32, %c0_i32_0 : i32, i32
  }
  func.func @transform_2(%arg0: i32) -> (i32, i32) {
    %c0_i32 = arith.constant 0 : i32
    %c0_i32_0 = arith.constant 0 : i32
    %c0_i32_1 = arith.constant 0 : i32
    return %c0_i32, %c0_i32_0 : i32, i32
  }
  func.func @transform_3(%arg0: i32) -> (i32, i32) {
    %c0_i32 = arith.constant 0 : i32
    %c0_i32_0 = arith.constant 0 : i32
    %c0_i32_1 = arith.constant 0 : i32
    return %c0_i32, %c0_i32_0 : i32, i32
  }
  func.func @transform_4(%arg0: i32) -> (i32, i32) {
    %c0_i32 = arith.constant 0 : i32
    %c0_i32_0 = arith.constant 0 : i32
    %c0_i32_1 = arith.constant 0 : i32
    return %c0_i32, %c0_i32_0 : i32, i32
  }
  func.func @transform_5(%arg0: i32) -> (i32, i32) {
    %c0_i32 = arith.constant 0 : i32
    %c0_i32_0 = arith.constant 0 : i32
    %c0_i32_1 = arith.constant 0 : i32
    return %c0_i32, %c0_i32_0 : i32, i32
  }
  func.func @transform_6(%arg0: i32) -> (i32, i32) {
    %c0_i32 = arith.constant 0 : i32
    %c0_i32_0 = arith.constant 0 : i32
    %c0_i32_1 = arith.constant 0 : i32
    return %c0_i32, %c0_i32_0 : i32, i32
  }
  func.func @transform_7(%arg0: i32) -> (i32, i32) {
    %c0_i32 = arith.constant 0 : i32
    %c0_i32_0 = arith.constant 0 : i32
    return %arg0, %c0_i32 : i32, i32
  }
}

</mosaic_0001>

<bundles_post_ra>
// kernel: femnist_cnn_forward.3
= control target key start
LH: loop header
LB: loop body
LE: loop exit
PB: predicated region body
PF: predicated region fallthrough
CT: control target
= control target key end

     0   :  { %s1127_s21 = smov 0   ;;  %s1129_s22 = smov 0   ;;  %s1241_s0 = inlined_call_operand.vmem [shape: bf16[32,512], index: 0, kind: input, shape index: {}]   ;;  %s1242_s1 = inlined_call_operand.vmem [shape: bf16[32,512], index: 1, kind: input, shape index: {}]   ;;  %s1243_s2 = inlined_call_operand.vmem [shape: bf16[32,512], index: 2, kind: input, shape index: {}]   ;;  %s1244_s3 = inlined_call_operand.vmem [shape: bf16[32,512], index: 3, kind: input, shape index: {}]   ;;  %s1245_s4 = inlined_call_operand.vmem [shape: bf16[16,32], index: 4, kind: input, shape index: {}]   ;;  %s1246_s5 = inlined_call_operand.vmem [shape: f32[16,1], index: 5, kind: input, shape index: {}]   ;;  %s1247_s6 = inlined_call_operand.vmem [shape: bf16[16,512], index: 6, kind: output, shape index: {}]  }
   0x1   :  { %s1131_s23 = smov 0  }
   0x2 LB: > { %s916_s24 = sadd.s32 4294967295, %s1089_s23   ;;  %s1144_s25 = sadd.s32 1, %s1089_s23   ;;  %s1089_s23 = sphi %s1131_s23, %s1252_s23   ;;  %s1085_s22 = sphi %s1129_s22, %s1251_s22   ;;  %s1081_s21 = sphi %s1127_s21, %s1250_s21  }
   0x3   : > { %s20_s26 = ssub.s32 %s1089_s23, %s1144_s25  ;;  %s23_s27 = sadd.s32 1, %s1085_s22 }
   0x4   : > { %p21_p0 = scmp.eq.s32.totalorder %s20_s26, 0  ;;  %p30_p1 = scmp.ne.s32.totalorder %s1085_s22, %s1081_s21 }
   0x5   : > { %p31_p2 = scmp.eq.s32.totalorder %s1089_s23, 0  ;;  %p180_p3 = scmp.eq.s32.totalorder %s916_s24, 1 }
   0x6   : > { %s1155_s28 = scalar_select %p21_p0, %s1085_s22, %s23_s27  }
   0x7   : > { %p1157_p4 = por %p31_p2, %p30_p1  ;;  %p1161_p5 = por %p180_p3, %p30_p1 }
   0x8   : > { %p919_p6 = scmp.ge.s32.totalorder %s1089_s23, 2 }
   0xa   : > { %208 = sbr.rel (%p919_p6) target bundleno = 47 (0x2f), region = 24 }
   0xf   : > { %211 = sbr.rel (!%p1157_p4) target bundleno = 23 (0x17), region = 28  ;;  %s213_s7 = sand.u32 (%p1157_p4), 1, %s1085_s22  }
  0x10   : > { %s1019_s8 = sshll.u32 (%p1157_p4), %s1089_s23, 3  ;;  %s920_s9 = sshll.u32 (%p1157_p4), %s213_s7, 5 }
  0x11   : > { %s218_s12 = scalar_lea.vmem (%p1157_p4), %s1241_s0, %s1019_s8  ;;  %s215_s13 = scalar_lea.vmem (%p1157_p4), [#allocation2], %s920_s9 }
  0x12   : > { %v253_v0 = vld [vmem:[%s218_s12] sm:$0xff] (%p1157_p4)  ;;  %v255_v1 = vld [vmem:[%s218_s12 + $0x10] sm:$0xff] (%p1157_p4) }
  0x13   : > { %v257_v2 = vld [vmem:[%s218_s12 + $0x20] sm:$0xff] (%p1157_p4)  ;;  %254 = vst [vmem:[%s215_s13] sm:$0xff] (%p1157_p4), %v253_v0  ;;  %v259_v3 = vld [vmem:[%s218_s12 + $0x30] sm:$0xff] (%p1157_p4) }
  0x14   : > { %256 = vst [vmem:[%s215_s13 + $0x8] sm:$0xff] %v255_v1 }
  0x15   : > { %258 = vst [vmem:[%s215_s13 + $0x10] sm:$0xff] %v257_v2 }
  0x16   : > { %260 = vst [vmem:[%s215_s13 + $0x18] sm:$0xff] %v259_v3 }
  0x17 PF: > { %266 = sbr.rel (!%p1157_p4) target bundleno = 31 (0x1f), region = 66  ;;  %s268_s14 = sand.u32 (%p1157_p4), 1, %s1085_s22  }
  0x18   : > { %s1020_s15 = sshll.u32 (%p1157_p4), %s1089_s23, 3  ;;  %s923_s16 = sshll.u32 (%p1157_p4), %s268_s14, 5 }
  0x19   : > { %s273_s19 = scalar_lea.vmem (%p1157_p4), %s1242_s1, %s1020_s15  ;;  %s270_s20 = scalar_lea.vmem (%p1157_p4), [#allocation3], %s923_s16 }
  0x1a   : > { %v308_v4 = vld [vmem:[%s273_s19] sm:$0xff] (%p1157_p4)  ;;  %v310_v5 = vld [vmem:[%s273_s19 + $0x10] sm:$0xff] (%p1157_p4) }
  0x1b   : > { %v312_v6 = vld [vmem:[%s273_s19 + $0x20] sm:$0xff] (%p1157_p4)  ;;  %309 = vst [vmem:[%s270_s20] sm:$0xff] (%p1157_p4), %v308_v4  ;;  %v314_v7 = vld [vmem:[%s273_s19 + $0x30] sm:$0xff] (%p1157_p4) }
  0x1c   : > { %311 = vst [vmem:[%s270_s20 + $0x8] sm:$0xff] %v310_v5 }
  0x1d   : > { %313 = vst [vmem:[%s270_s20 + $0x10] sm:$0xff] %v312_v6 }
  0x1e   : > { %315 = vst [vmem:[%s270_s20 + $0x18] sm:$0xff] %v314_v7 }
  0x1f PF: > { %321 = sbr.rel (!%p1157_p4) target bundleno = 39 (0x27), region = 104  ;;  %s323_s26 = sand.u32 (%p1157_p4), 1, %s1085_s22  }
  0x20   : > { %s1021_s27 = sshll.u32 (%p1157_p4), %s1089_s23, 3  ;;  %s926_s7 = sshll.u32 (%p1157_p4), %s323_s26, 5 }
  0x21   : > { %s328_s10 = scalar_lea.vmem (%p1157_p4), %s1243_s2, %s1021_s27  ;;  %s325_s11 = scalar_lea.vmem (%p1157_p4), [#allocation4], %s926_s7 }
  0x22   : > { %v363_v8 = vld [vmem:[%s328_s10] sm:$0xff] (%p1157_p4)  ;;  %v365_v9 = vld [vmem:[%s328_s10 + $0x10] sm:$0xff] (%p1157_p4) }
  0x23   : > { %v367_v10 = vld [vmem:[%s328_s10 + $0x20] sm:$0xff] (%p1157_p4)  ;;  %364 = vst [vmem:[%s325_s11] sm:$0xff] (%p1157_p4), %v363_v8  ;;  %v369_v11 = vld [vmem:[%s328_s10 + $0x30] sm:$0xff] (%p1157_p4) }
  0x24   : > { %366 = vst [vmem:[%s325_s11 + $0x8] sm:$0xff] %v365_v9 }
  0x25   : > { %368 = vst [vmem:[%s325_s11 + $0x10] sm:$0xff] %v367_v10 }
  0x26   : > { %370 = vst [vmem:[%s325_s11 + $0x18] sm:$0xff] %v369_v11 }
  0x27 PF: > { %376 = sbr.rel (!%p1157_p4) target bundleno = 47 (0x2f), region = 142  ;;  %s378_s12 = sand.u32 (%p1157_p4), 1, %s1085_s22  }
  0x28   : > { %s1022_s13 = sshll.u32 (%p1157_p4), %s1089_s23, 3  ;;  %s929_s14 = sshll.u32 (%p1157_p4), %s378_s12, 5 }
  0x29   : > { %s383_s17 = scalar_lea.vmem (%p1157_p4), %s1244_s3, %s1022_s13  ;;  %s380_s18 = scalar_lea.vmem (%p1157_p4), [#allocation5], %s929_s14 }
  0x2a   : > { %v418_v12 = vld [vmem:[%s383_s17] sm:$0xff] (%p1157_p4)  ;;  %v420_v13 = vld [vmem:[%s383_s17 + $0x10] sm:$0xff] (%p1157_p4) }
  0x2b   : > { %v422_v14 = vld [vmem:[%s383_s17 + $0x20] sm:$0xff] (%p1157_p4)  ;;  %419 = vst [vmem:[%s380_s18] sm:$0xff] (%p1157_p4), %v418_v12  ;;  %v424_v15 = vld [vmem:[%s383_s17 + $0x30] sm:$0xff] (%p1157_p4) }
  0x2c   : > { %421 = vst [vmem:[%s380_s18 + $0x8] sm:$0xff] %v420_v13 }
  0x2d   : > { %423 = vst [vmem:[%s380_s18 + $0x10] sm:$0xff] %v422_v14 }
  0x2e   : > { %425 = vst [vmem:[%s380_s18 + $0x18] sm:$0xff] %v424_v15 }
  0x2f PF: > { %p932_p7 = scmp.ge.s32.totalorder %s1089_s23, 1  ;;  %p430_p8 = scmp.lt.s32.totalorder %s1089_s23, 3 }
  0x31   : > { %p431_p9 = pnand %p932_p7, %p430_p8 }
  0x32   : > { %s437_s29 = sand.u32 (!%p431_p9), 1, %s1081_s21  }
  0x33   : > { %434 = sbr.rel (%p431_p9) target bundleno = 241 (0xf1), region = 180  ;;  %s1202_s26 = sshll.u32 (!%p431_p9), %s437_s29, 5 }
  0x34   : > { %s439_s27 = scalar_lea.vmem (!%p431_p9), [#allocation2], %s1202_s26  ;;  %s446_s7 = scalar_lea.vmem (!%p431_p9), [#allocation3], %s1202_s26 }
  0x35   : > { %s460_s12 = scalar_lea.vmem (!%p431_p9), [#allocation5], %s1202_s26  ;;  %s453_s13 = scalar_lea.vmem (!%p431_p9), [#allocation4], %s1202_s26 }
  0x36   : > { %s937_s14 = sshll.u32 (!%p431_p9), %s437_s29, 4 }
  0x37   : > { %s497_s15 = scalar_lea.vmem (!%p431_p9), [#allocation6], %s937_s14 }
  0x38   : > { %v735_v16 = vld [vmem:[%s1246_s5] sm:$0xff]  ;;  %v1091_v17 = vmov 0   ;;  %v952_v18 = vld [vmem:[%s439_s27 + $0x10] sm:$0xf]  ;;  %v1027_v19 = vld [vmem:[%s439_s27 + $0x14] sm:$0xf0] }
  0x39   : > { %1066 = vset.pattern.permute.xlu0 %v1091_v17  ;;  %v1026_v20 = vld [vmem:[%s439_s27 + $0x14] sm:$0xf]  ;;  %v953_v21 = vor.u32 %v1027_v19, %v952_v18  ;;  %v954_v22 = vld [vmem:[%s439_s27 + $0x18] sm:$0xf0]  ;;  %v970_v23 = vld [vmem:[%s446_s7 + $0x10] sm:$0xf] }
  0x3a   : > { %739 = vperm.xlu0 %1066, %v735_v16   ;;  %v1031_v24 = vld [vmem:[%s446_s7 + $0x14] sm:$0xf0]  ;;  %v957_v25 = vor.u32 %v1026_v20, %v954_v22  ;;  %v1030_v27 = vld [vmem:[%s446_s7 + $0x14] sm:$0xf]  ;;  %v972_v28 = vld [vmem:[%s446_s7 + $0x18] sm:$0xf0] }
  0x3b   : > { %v971_v26 = vor.u32 %v1031_v24, %v970_v23  ;;  %v944_v29 = vld [vmem:[%s439_s27] sm:$0xf]  ;;  %v736_v30 = vld [vmem:[%s1246_s5 + $0x8] sm:$0xff]  ;;  %545 = vmatpush.bf16.msra.mxu0 %v953_v21  ;;  %v975_v31 = vor.u32 %v1030_v27, %v972_v28  ;;  %v1024_v33 = vld [vmem:[%s439_s27 + $0x4] sm:$0xf]  ;;  %vm535_vm0 = vcmask 261120  }
  0x3c   : > { %v1025_v32 = vld [vmem:[%s439_s27 + $0x4] sm:$0xf0]  ;;  %v946_v34 = vld [vmem:[%s439_s27 + $0x8] sm:$0xf0]  ;;  %559 = vmatpush.bf16.msra.mxu1 %v957_v25  ;;  %v962_v37 = vld [vmem:[%s446_s7] sm:$0xf] }
  0x3d   : > { %597 = vmatpush.bf16.msra.mxu2 %v971_v26  ;;  %v945_v35 = vor.u32 %v1025_v32, %v944_v29  ;;  %v949_v36 = vor.u32 %v1024_v33, %v946_v34  ;;  %v1029_v38 = vld [vmem:[%s446_s7 + $0x4] sm:$0xf0]  ;;  %v1028_v39 = vld [vmem:[%s446_s7 + $0x4] sm:$0xf]  ;;  %611 = vmatpush.bf16.msra.mxu3 %v975_v31  ;;  %v964_v41 = vld [vmem:[%s446_s7 + $0x8] sm:$0xf0] }
  0x3e   : > { %v963_v40 = vor.u32 %v1029_v38, %v962_v37  ;;  %v1023_v42 = vld [vmem:[%s1245_s4] sm:$0xff]  ;;  %v967_v43 = vor.u32 %v1028_v39, %v964_v41  ;;  %v1006_v44 = vld [vmem:[%s460_s12 + $0x10] sm:$0xf]  ;;  %v1039_v45 = vld [vmem:[%s460_s12 + $0x14] sm:$0xf0]  ;;  %s1040_s21 = sshll.u32 (%p1161_p5), %s916_s24, 3 }
  0x3f   : > { %v1038_v46 = vld [vmem:[%s460_s12 + $0x14] sm:$0xf]  ;;  %546 = vmatpush.bf16.msra.mxu0 %v945_v35  ;;  %v1007_v47 = vor.u32 %v1039_v45, %v1006_v44  ;;  %v1008_v48 = vld [vmem:[%s460_s12 + $0x18] sm:$0xf0]  ;;  %v988_v49 = vld [vmem:[%s453_s13 + $0x10] sm:$0xf]  ;;  %s768_s18 = scalar_lea.vmem (%p1161_p5), %s1247_s6, %s1040_s21 }
  0x40   : > { %v1035_v50 = vld [vmem:[%s453_s13 + $0x14] sm:$0xf0]  ;;  %560 = vmatpush.bf16.msra.mxu1 %v949_v36  ;;  %v1011_v51 = vor.u32 %v1038_v46, %v1008_v48  ;;  %v1034_v53 = vld [vmem:[%s453_s13 + $0x14] sm:$0xf]  ;;  %v990_v54 = vld [vmem:[%s453_s13 + $0x18] sm:$0xf0] }
  0x41   : > { %598 = vmatpush.bf16.msra.mxu2 %v963_v40  ;;  %v989_v52 = vor.u32 %v1035_v50, %v988_v49  ;;  %v998_v55 = vld [vmem:[%s460_s12] sm:$0xf]  ;;  %612 = vmatpush.bf16.msra.mxu3 %v967_v43  ;;  %v993_v56 = vor.u32 %v1034_v53, %v990_v54  ;;  %v1037_v57 = vld [vmem:[%s460_s12 + $0x4] sm:$0xf0]  ;;  %v1036_v58 = vld [vmem:[%s460_s12 + $0x4] sm:$0xf] }
  0x42   : > { %744 = vperm.xlu0 %1066, %v736_v30   ;;  %v1000_v59 = vld [vmem:[%s460_s12 + $0x8] sm:$0xf0]  ;;  %958 = vmatmul.msk.bf16.vlgmr.msra.gmra.mxu0 %vm535_vm0, %v1023_v42  ;;  %v999_v60 = vor.u32 %v1037_v57, %v998_v55  ;;  %v980_v62 = vld [vmem:[%s453_s13] sm:$0xf]  ;;  %v1033_v63 = vld [vmem:[%s453_s13 + $0x4] sm:$0xf0] }
  0x43   : > { %v1003_v61 = vor.u32 %v1036_v58, %v1000_v59  ;;  %v1032_v0 = vld [vmem:[%s453_s13 + $0x4] sm:$0xf]  ;;  %959 = vmatmul.msk.bf16.vlgmr.msra.gmra.mxu1 %vm535_vm0, %v1023_v42  ;;  %v982_v1 = vld [vmem:[%s453_s13 + $0x8] sm:$0xf0]  ;;  %653 = vmatpush.bf16.msrb.mxu0 %v989_v52  ;;  %v981_v2 = vor.u32 %v1033_v63, %v980_v62 }
  0x44   : > { %976 = vmatmul.msk.bf16.vlgmr.msra.gmra.mxu2 %vm535_vm0, %v1023_v42  ;;  %977 = vmatmul.msk.bf16.vlgmr.msra.gmra.mxu3 %vm535_vm0, %v1023_v42  ;;  %v985_v3 = vor.u32 %v1032_v0, %v982_v1 }
  0x45   : > { %709 = vmatpush.bf16.msrb.mxu2 %v1007_v47  ;;  %723 = vmatpush.bf16.msrb.mxu3 %v1011_v51 }
  0x46   : > { %667 = vmatpush.bf16.msrb.mxu1 %v993_v56 }
  0x47   : > { %654 = vmatpush.bf16.msrb.mxu0 %v981_v2 }
  0x49   : > { %710 = vmatpush.bf16.msrb.mxu2 %v999_v60  ;;  %724 = vmatpush.bf16.msrb.mxu3 %v1003_v61 }
  0x4a   : > { %668 = vmatpush.bf16.msrb.mxu1 %v985_v3 }
  0x52   : > { %994 = vmatmul.msk.bf16.vlgmr.msrb.gmra.mxu0 %vm535_vm0, %v1023_v42 }
  0x53   : > { %995 = vmatmul.msk.bf16.vlgmr.msrb.gmra.mxu1 %vm535_vm0, %v1023_v42 }
  0x54   : > { %1012 = vmatmul.msk.bf16.vlgmr.msrb.gmra.mxu2 %vm535_vm0, %v1023_v42  ;;  %1013 = vmatmul.msk.bf16.vlgmr.msrb.gmra.mxu3 %vm535_vm0, %v1023_v42 }
  0xac   : > { %v740_v17 = vpop.permute.xlu0 %739 }
  0xb4   : > { %v745_v37 = vpop.permute.xlu0 %744 }
  0xbf   : > { %v548_v4 = vpop.f32.mrf.mxu0 }
  0xc0   : > { %v562_v5 = vpop.f32.mrf.mxu1 }
  0xc7   : > { %v600_v6 = vpop.f32.mrf.mxu2  ;;  %v614_v7 = vpop.f32.mrf.mxu3 }
  0xc8   : > { %v550_v8 = vpop.f32.mrf.mxu0  ;;  %v564_v9 = vpop.f32.mrf.mxu1  ;;  %v619_v14 = vmax.f32 %v548_v4, %v600_v6  ;;  %v620_v15 = vmax.f32 %v562_v5, %v614_v7 }
  0xcf   : > { %v602_v10 = vpop.f32.mrf.mxu2  ;;  %v616_v11 = vpop.f32.mrf.mxu3 }
  0xd0   : > { %v656_v12 = vpop.f32.mrf.mxu0  ;;  %v670_v13 = vpop.f32.mrf.mxu1  ;;  %v621_v26 = vmax.f32 %v550_v8, %v602_v10  ;;  %v622_v29 = vmax.f32 %v564_v9, %v616_v11 }
  0xd1   : > { %v675_v16 = vmax.f32 %v619_v14, %v656_v12  ;;  %v676_v18 = vmax.f32 %v620_v15, %v670_v13 }
  0xd7   : > { %v712_v19 = vpop.f32.mrf.mxu2  ;;  %v726_v21 = vpop.f32.mrf.mxu3 }
  0xd8   : > { %v731_v20 = vmax.f32 %v675_v16, %v712_v19  ;;  %v732_v22 = vmax.f32 %v676_v18, %v726_v21  ;;  %v658_v25 = vpop.f32.mrf.mxu0  ;;  %v672_v28 = vpop.f32.mrf.mxu1 }
  0xd9   : > { %v677_v31 = vmax.f32 %v621_v26, %v658_v25  ;;  %v678_v33 = vmax.f32 %v622_v29, %v672_v28 }
  0xda   : > { %v747_v23 = vadd.f32 %v740_v17, %v731_v20  ;;  %v748_v24 = vadd.f32 %v740_v17, %v732_v22 }
  0xdc   : > { %v751_v27 = vmax.f32 %v747_v23, 0.0  ;;  %v752_v30 = vmax.f32 %v748_v24, 0.0 }
  0xde   : > { %v755_v32 = vpack.c.bf16 %v752_v30, %v751_v27 }
  0xdf   : > { %v714_v34 = vpop.f32.mrf.mxu2  ;;  %v728_v36 = vpop.f32.mrf.mxu3 }
  0xe0   : > { %v733_v35 = vmax.f32 %v677_v31, %v714_v34  ;;  %757 = vst [vmem:[%s497_s15] sm:$0xff] %v755_v32  ;;  %v734_v38 = vmax.f32 %v678_v33, %v728_v36 }
  0xe2   : > { %v749_v39 = vadd.f32 %v745_v37, %v733_v35  ;;  %v750_v40 = vadd.f32 %v745_v37, %v734_v38 }
  0xe4   : > { %v753_v41 = vmax.f32 %v749_v39, 0.0  ;;  %v754_v42 = vmax.f32 %v750_v40, 0.0  ;;  %765 = sbr.rel (!%p1161_p5) target bundleno = 241 (0xf1), region = 200 }
  0xe6   : > { %v756_v43 = vpack.c.bf16 %v754_v42, %v753_v41 }
  0xe7   : > { %v799_v44 = vld [vmem:[%s497_s15] sm:$0xff] (%p1161_p5) }
  0xe8   : > { %758 = vst [vmem:[%s497_s15 + $0x8] sm:$0xff] %v756_v43 }
  0xe9   : > { %800 = vst [vmem:[%s768_s18] sm:$0xff] %v799_v44 }
  0xef   : > { %v801_v45 = vld [vmem:[%s497_s15 + $0x8] sm:$0xff] }
  0xf0   : > { %802 = vst [vmem:[%s768_s18 + $0x10] sm:$0xff] %v801_v45 }
  0xf1 PF: > { %p13_p10 = scmp.ge.s32.totalorder %s1144_s25, 4   ;;  %s1250_s21 = smov %s1085_s22 }
  0xf2   : > { %s1251_s22 = smov %s1155_s28  ;;  %s1252_s23 = smov %s1144_s25 }
  0xf3   :  { %15 = sbr.rel (!%p13_p10) target bundleno = 2 (0x2), region = 293 }

// kernel: femnist_cnn_forward.4
= control target key start
LH: loop header
LB: loop body
LE: loop exit
PB: predicated region body
PF: predicated region fallthrough
CT: control target
= control target key end

     0   :  { %s1744_s21 = smov 0   ;;  %s1746_s22 = smov 0   ;;  %s2087_s0 = inlined_call_operand.vmem [shape: bf16[160,256], index: 0, kind: input, shape index: {}]   ;;  %s2088_s1 = inlined_call_operand.vmem [shape: bf16[160,256], index: 1, kind: input, shape index: {}]   ;;  %s2089_s2 = inlined_call_operand.vmem [shape: bf16[160,256], index: 2, kind: input, shape index: {}]   ;;  %s2090_s3 = inlined_call_operand.vmem [shape: bf16[160,256], index: 3, kind: input, shape index: {}]   ;;  %s2091_s4 = inlined_call_operand.vmem [shape: bf16[16,160], index: 4, kind: input, shape index: {}]   ;;  %s2092_s5 = inlined_call_operand.vmem [shape: f32[16,1], index: 5, kind: input, shape index: {}]   ;;  %s2093_s6 = inlined_call_operand.vmem [shape: bf16[16,256], index: 6, kind: output, shape index: {}]  }
   0x1   :  { %s1748_s23 = smov 0  }
   0x2 LB: > { %s1420_s24 = sadd.s32 4294967295, %s1706_s23   ;;  %s1761_s25 = sadd.s32 1, %s1706_s23   ;;  %s1706_s23 = sphi %s1748_s23, %s2098_s23   ;;  %s1702_s22 = sphi %s1746_s22, %s2097_s22   ;;  %s1698_s21 = sphi %s1744_s21, %s2096_s21  }
   0x3   : > { %s20_s26 = ssub.s32 %s1706_s23, %s1761_s25  ;;  %s23_s27 = sadd.s32 1, %s1702_s22 }
   0x4   : > { %p21_p0 = scmp.eq.s32.totalorder %s20_s26, 0  ;;  %p30_p1 = scmp.ne.s32.totalorder %s1702_s22, %s1698_s21 }
   0x5   : > { %p31_p2 = scmp.eq.s32.totalorder %s1706_s23, 0  ;;  %p180_p3 = scmp.eq.s32.totalorder %s1420_s24, 1 }
   0x6   : > { %s1772_s28 = scalar_select %p21_p0, %s1702_s22, %s23_s27  }
   0x7   : > { %p1774_p4 = por %p31_p2, %p30_p1  ;;  %p1778_p5 = por %p180_p3, %p30_p1 }
   0x8   : > { %p1423_p6 = scmp.ge.s32.totalorder %s1706_s23, 2 }
   0xa   : > { %208 = sbr.rel (%p1423_p6) target bundleno = 115 (0x73), region = 24 }
   0xf   : > { %211 = sbr.rel (!%p1774_p4) target bundleno = 40 (0x28), region = 28  ;;  %s213_s7 = sand.u32 (%p1774_p4), 1, %s1702_s22  }
  0x10   : > { %s1424_s8 = sshll.u32 (%p1774_p4), %s1706_s23, 2  ;;  %s1653_s9 = smul.u32 (%p1774_p4), 80, %s213_s7 }
  0x11   : > { %s1790_s12 = scalar_lea.vmem (%p1774_p4), %s2087_s0, %s1424_s8 }
  0x12   : > { %v234_v0 = vld [vmem:[%s1790_s12] sm:$0xf] (%p1774_p4)  ;;  %v236_v1 = vld [vmem:[%s1790_s12 + $0x8] sm:$0xf] (%p1774_p4)  ;;  %v238_v2 = vld [vmem:[%s1790_s12 + $0x10] sm:$0xf] (%p1774_p4) }
  0x13   : > { %s1795_s13 = scalar_lea.vmem (%p1774_p4), [#allocation2], %s1653_s9  ;;  %v240_v3 = vld [vmem:[%s1790_s12 + $0x18] sm:$0xf] (%p1774_p4)  ;;  %v242_v4 = vld [vmem:[%s1790_s12 + $0x20] sm:$0xf] (%p1774_p4) }
  0x14   : > { %235 = vst [vmem:[%s1795_s13] sm:$0xf] %v234_v0  ;;  %v244_v5 = vld [vmem:[%s1790_s12 + $0x28] sm:$0xf]  ;;  %v246_v6 = vld [vmem:[%s1790_s12 + $0x30] sm:$0xf] }
  0x15   : > { %237 = vst [vmem:[%s1795_s13 + $0x4] sm:$0xf] %v236_v1  ;;  %v248_v7 = vld [vmem:[%s1790_s12 + $0x38] sm:$0xf]  ;;  %v250_v8 = vld [vmem:[%s1790_s12 + $0x40] sm:$0xf] }
  0x16   : > { %239 = vst [vmem:[%s1795_s13 + $0x8] sm:$0xf] %v238_v2  ;;  %v252_v9 = vld [vmem:[%s1790_s12 + $0x48] sm:$0xf]  ;;  %v254_v10 = vld [vmem:[%s1790_s12 + $0x50] sm:$0xf] }
  0x17   : > { %241 = vst [vmem:[%s1795_s13 + $0xc] sm:$0xf] %v240_v3  ;;  %v256_v11 = vld [vmem:[%s1790_s12 + $0x58] sm:$0xf]  ;;  %v258_v12 = vld [vmem:[%s1790_s12 + $0x60] sm:$0xf] }
  0x18   : > { %243 = vst [vmem:[%s1795_s13 + $0x10] sm:$0xf] %v242_v4  ;;  %v260_v13 = vld [vmem:[%s1790_s12 + $0x68] sm:$0xf]  ;;  %v262_v14 = vld [vmem:[%s1790_s12 + $0x70] sm:$0xf] }
  0x19   : > { %245 = vst [vmem:[%s1795_s13 + $0x14] sm:$0xf] %v244_v5  ;;  %v264_v15 = vld [vmem:[%s1790_s12 + $0x78] sm:$0xf]  ;;  %v266_v16 = vld [vmem:[%s1790_s12 + $0x80] sm:$0xf] }
  0x1a   : > { %247 = vst [vmem:[%s1795_s13 + $0x18] sm:$0xf] %v246_v6  ;;  %v268_v17 = vld [vmem:[%s1790_s12 + $0x88] sm:$0xf]  ;;  %v270_v18 = vld [vmem:[%s1790_s12 + $0x90] sm:$0xf] }
  0x1b   : > { %249 = vst [vmem:[%s1795_s13 + $0x1c] sm:$0xf] %v248_v7  ;;  %v272_v19 = vld [vmem:[%s1790_s12 + $0x98] sm:$0xf] }
  0x1c   : > { %251 = vst [vmem:[%s1795_s13 + $0x20] sm:$0xf] %v250_v8 }
  0x1d   : > { %253 = vst [vmem:[%s1795_s13 + $0x24] sm:$0xf] %v252_v9 }
  0x1e   : > { %255 = vst [vmem:[%s1795_s13 + $0x28] sm:$0xf] %v254_v10 }
  0x1f   : > { %257 = vst [vmem:[%s1795_s13 + $0x2c] sm:$0xf] %v256_v11 }
  0x20   : > { %259 = vst [vmem:[%s1795_s13 + $0x30] sm:$0xf] %v258_v12 }
  0x21   : > { %261 = vst [vmem:[%s1795_s13 + $0x34] sm:$0xf] %v260_v13 }
  0x22   : > { %263 = vst [vmem:[%s1795_s13 + $0x38] sm:$0xf] %v262_v14 }
  0x23   : > { %265 = vst [vmem:[%s1795_s13 + $0x3c] sm:$0xf] %v264_v15 }
  0x24   : > { %267 = vst [vmem:[%s1795_s13 + $0x40] sm:$0xf] %v266_v16 }
  0x25   : > { %269 = vst [vmem:[%s1795_s13 + $0x44] sm:$0xf] %v268_v17 }
  0x26   : > { %271 = vst [vmem:[%s1795_s13 + $0x48] sm:$0xf] %v270_v18 }
  0x27   : > { %273 = vst [vmem:[%s1795_s13 + $0x4c] sm:$0xf] %v272_v19 }
  0x28 PF: > { %337 = sbr.rel (!%p1774_p4) target bundleno = 65 (0x41), region = 69  ;;  %s339_s14 = sand.u32 (%p1774_p4), 1, %s1702_s22  }
  0x29   : > { %s1425_s15 = sshll.u32 (%p1774_p4), %s1706_s23, 2  ;;  %s1654_s16 = smul.u32 (%p1774_p4), 80, %s339_s14 }
  0x2a   : > { %s1841_s19 = scalar_lea.vmem (%p1774_p4), %s2088_s1, %s1425_s15 }
  0x2b   : > { %v360_v20 = vld [vmem:[%s1841_s19] sm:$0xf] (%p1774_p4)  ;;  %v362_v21 = vld [vmem:[%s1841_s19 + $0x8] sm:$0xf] (%p1774_p4)  ;;  %v364_v22 = vld [vmem:[%s1841_s19 + $0x10] sm:$0xf] (%p1774_p4) }
  0x2c   : > { %s1846_s20 = scalar_lea.vmem (%p1774_p4), [#allocation3], %s1654_s16  ;;  %v366_v23 = vld [vmem:[%s1841_s19 + $0x18] sm:$0xf] (%p1774_p4)  ;;  %v368_v24 = vld [vmem:[%s1841_s19 + $0x20] sm:$0xf] (%p1774_p4) }
  0x2d   : > { %361 = vst [vmem:[%s1846_s20] sm:$0xf] %v360_v20  ;;  %v370_v25 = vld [vmem:[%s1841_s19 + $0x28] sm:$0xf]  ;;  %v372_v26 = vld [vmem:[%s1841_s19 + $0x30] sm:$0xf] }
  0x2e   : > { %363 = vst [vmem:[%s1846_s20 + $0x4] sm:$0xf] %v362_v21  ;;  %v374_v27 = vld [vmem:[%s1841_s19 + $0x38] sm:$0xf]  ;;  %v376_v28 = vld [vmem:[%s1841_s19 + $0x40] sm:$0xf] }
  0x2f   : > { %365 = vst [vmem:[%s1846_s20 + $0x8] sm:$0xf] %v364_v22  ;;  %v378_v29 = vld [vmem:[%s1841_s19 + $0x48] sm:$0xf]  ;;  %v380_v30 = vld [vmem:[%s1841_s19 + $0x50] sm:$0xf] }
  0x30   : > { %367 = vst [vmem:[%s1846_s20 + $0xc] sm:$0xf] %v366_v23  ;;  %v382_v31 = vld [vmem:[%s1841_s19 + $0x58] sm:$0xf]  ;;  %v384_v32 = vld [vmem:[%s1841_s19 + $0x60] sm:$0xf] }
  0x31   : > { %369 = vst [vmem:[%s1846_s20 + $0x10] sm:$0xf] %v368_v24  ;;  %v386_v33 = vld [vmem:[%s1841_s19 + $0x68] sm:$0xf]  ;;  %v388_v34 = vld [vmem:[%s1841_s19 + $0x70] sm:$0xf] }
  0x32   : > { %371 = vst [vmem:[%s1846_s20 + $0x14] sm:$0xf] %v370_v25  ;;  %v390_v35 = vld [vmem:[%s1841_s19 + $0x78] sm:$0xf]  ;;  %v392_v36 = vld [vmem:[%s1841_s19 + $0x80] sm:$0xf] }
  0x33   : > { %373 = vst [vmem:[%s1846_s20 + $0x18] sm:$0xf] %v372_v26  ;;  %v394_v37 = vld [vmem:[%s1841_s19 + $0x88] sm:$0xf]  ;;  %v396_v38 = vld [vmem:[%s1841_s19 + $0x90] sm:$0xf] }
  0x34   : > { %375 = vst [vmem:[%s1846_s20 + $0x1c] sm:$0xf] %v374_v27  ;;  %v398_v39 = vld [vmem:[%s1841_s19 + $0x98] sm:$0xf] }
  0x35   : > { %377 = vst [vmem:[%s1846_s20 + $0x20] sm:$0xf] %v376_v28 }
  0x36   : > { %379 = vst [vmem:[%s1846_s20 + $0x24] sm:$0xf] %v378_v29 }
  0x37   : > { %381 = vst [vmem:[%s1846_s20 + $0x28] sm:$0xf] %v380_v30 }
  0x38   : > { %383 = vst [vmem:[%s1846_s20 + $0x2c] sm:$0xf] %v382_v31 }
  0x39   : > { %385 = vst [vmem:[%s1846_s20 + $0x30] sm:$0xf] %v384_v32 }
  0x3a   : > { %387 = vst [vmem:[%s1846_s20 + $0x34] sm:$0xf] %v386_v33 }
  0x3b   : > { %389 = vst [vmem:[%s1846_s20 + $0x38] sm:$0xf] %v388_v34 }
  0x3c   : > { %391 = vst [vmem:[%s1846_s20 + $0x3c] sm:$0xf] %v390_v35 }
  0x3d   : > { %393 = vst [vmem:[%s1846_s20 + $0x40] sm:$0xf] %v392_v36 }
  0x3e   : > { %395 = vst [vmem:[%s1846_s20 + $0x44] sm:$0xf] %v394_v37 }
  0x3f   : > { %397 = vst [vmem:[%s1846_s20 + $0x48] sm:$0xf] %v396_v38 }
  0x40   : > { %399 = vst [vmem:[%s1846_s20 + $0x4c] sm:$0xf] %v398_v39 }
  0x41 PF: > { %463 = sbr.rel (!%p1774_p4) target bundleno = 90 (0x5a), region = 110  ;;  %s465_s26 = sand.u32 (%p1774_p4), 1, %s1702_s22  }
  0x42   : > { %s1426_s27 = sshll.u32 (%p1774_p4), %s1706_s23, 2  ;;  %s1655_s7 = smul.u32 (%p1774_p4), 80, %s465_s26 }
  0x43   : > { %s1892_s10 = scalar_lea.vmem (%p1774_p4), %s2089_s2, %s1426_s27 }
  0x44   : > { %v486_v40 = vld [vmem:[%s1892_s10] sm:$0xf] (%p1774_p4)  ;;  %v488_v41 = vld [vmem:[%s1892_s10 + $0x8] sm:$0xf] (%p1774_p4)  ;;  %v490_v42 = vld [vmem:[%s1892_s10 + $0x10] sm:$0xf] (%p1774_p4) }
  0x45   : > { %s1897_s11 = scalar_lea.vmem (%p1774_p4), [#allocation4], %s1655_s7  ;;  %v492_v43 = vld [vmem:[%s1892_s10 + $0x18] sm:$0xf] (%p1774_p4)  ;;  %v494_v44 = vld [vmem:[%s1892_s10 + $0x20] sm:$0xf] (%p1774_p4) }
  0x46   : > { %487 = vst [vmem:[%s1897_s11] sm:$0xf] %v486_v40  ;;  %v496_v45 = vld [vmem:[%s1892_s10 + $0x28] sm:$0xf]  ;;  %v498_v46 = vld [vmem:[%s1892_s10 + $0x30] sm:$0xf] }
  0x47   : > { %489 = vst [vmem:[%s1897_s11 + $0x4] sm:$0xf] %v488_v41  ;;  %v500_v47 = vld [vmem:[%s1892_s10 + $0x38] sm:$0xf]  ;;  %v502_v48 = vld [vmem:[%s1892_s10 + $0x40] sm:$0xf] }
  0x48   : > { %491 = vst [vmem:[%s1897_s11 + $0x8] sm:$0xf] %v490_v42  ;;  %v504_v49 = vld [vmem:[%s1892_s10 + $0x48] sm:$0xf]  ;;  %v506_v50 = vld [vmem:[%s1892_s10 + $0x50] sm:$0xf] }
  0x49   : > { %493 = vst [vmem:[%s1897_s11 + $0xc] sm:$0xf] %v492_v43  ;;  %v508_v51 = vld [vmem:[%s1892_s10 + $0x58] sm:$0xf]  ;;  %v510_v52 = vld [vmem:[%s1892_s10 + $0x60] sm:$0xf] }
  0x4a   : > { %495 = vst [vmem:[%s1897_s11 + $0x10] sm:$0xf] %v494_v44  ;;  %v512_v53 = vld [vmem:[%s1892_s10 + $0x68] sm:$0xf]  ;;  %v514_v54 = vld [vmem:[%s1892_s10 + $0x70] sm:$0xf] }
  0x4b   : > { %497 = vst [vmem:[%s1897_s11 + $0x14] sm:$0xf] %v496_v45  ;;  %v516_v55 = vld [vmem:[%s1892_s10 + $0x78] sm:$0xf]  ;;  %v518_v56 = vld [vmem:[%s1892_s10 + $0x80] sm:$0xf] }
  0x4c   : > { %499 = vst [vmem:[%s1897_s11 + $0x18] sm:$0xf] %v498_v46  ;;  %v520_v57 = vld [vmem:[%s1892_s10 + $0x88] sm:$0xf]  ;;  %v522_v58 = vld [vmem:[%s1892_s10 + $0x90] sm:$0xf] }
  0x4d   : > { %501 = vst [vmem:[%s1897_s11 + $0x1c] sm:$0xf] %v500_v47  ;;  %v524_v59 = vld [vmem:[%s1892_s10 + $0x98] sm:$0xf] }
  0x4e   : > { %503 = vst [vmem:[%s1897_s11 + $0x20] sm:$0xf] %v502_v48 }
  0x4f   : > { %505 = vst [vmem:[%s1897_s11 + $0x24] sm:$0xf] %v504_v49 }
  0x50   : > { %507 = vst [vmem:[%s1897_s11 + $0x28] sm:$0xf] %v506_v50 }
  0x51   : > { %509 = vst [vmem:[%s1897_s11 + $0x2c] sm:$0xf] %v508_v51 }
  0x52   : > { %511 = vst [vmem:[%s1897_s11 + $0x30] sm:$0xf] %v510_v52 }
  0x53   : > { %513 = vst [vmem:[%s1897_s11 + $0x34] sm:$0xf] %v512_v53 }
  0x54   : > { %515 = vst [vmem:[%s1897_s11 + $0x38] sm:$0xf] %v514_v54 }
  0x55   : > { %517 = vst [vmem:[%s1897_s11 + $0x3c] sm:$0xf] %v516_v55 }
  0x56   : > { %519 = vst [vmem:[%s1897_s11 + $0x40] sm:$0xf] %v518_v56 }
  0x57   : > { %521 = vst [vmem:[%s1897_s11 + $0x44] sm:$0xf] %v520_v57 }
  0x58   : > { %523 = vst [vmem:[%s1897_s11 + $0x48] sm:$0xf] %v522_v58 }
  0x59   : > { %525 = vst [vmem:[%s1897_s11 + $0x4c] sm:$0xf] %v524_v59 }
  0x5a PF: > { %589 = sbr.rel (!%p1774_p4) target bundleno = 115 (0x73), region = 151  ;;  %s591_s12 = sand.u32 (%p1774_p4), 1, %s1702_s22  }
  0x5b   : > { %s1427_s13 = sshll.u32 (%p1774_p4), %s1706_s23, 2  ;;  %s1656_s14 = smul.u32 (%p1774_p4), 80, %s591_s12 }
  0x5c   : > { %s1943_s17 = scalar_lea.vmem (%p1774_p4), %s2090_s3, %s1427_s13 }
  0x5d   : > { %v612_v60 = vld [vmem:[%s1943_s17] sm:$0xf] (%p1774_p4)  ;;  %v614_v61 = vld [vmem:[%s1943_s17 + $0x8] sm:$0xf] (%p1774_p4)  ;;  %v616_v62 = vld [vmem:[%s1943_s17 + $0x10] sm:$0xf] (%p1774_p4) }
  0x5e   : > { %s1948_s29 = scalar_lea.vmem (%p1774_p4), [#allocation5], %s1656_s14  ;;  %v618_v63 = vld [vmem:[%s1943_s17 + $0x18] sm:$0xf] (%p1774_p4)  ;;  %v620_v0 = vld [vmem:[%s1943_s17 + $0x20] sm:$0xf] (%p1774_p4) }
  0x5f   : > { %613 = vst [vmem:[%s1948_s29] sm:$0xf] %v612_v60  ;;  %v622_v1 = vld [vmem:[%s1943_s17 + $0x28] sm:$0xf]  ;;  %v624_v2 = vld [vmem:[%s1943_s17 + $0x30] sm:$0xf] }
  0x60   : > { %615 = vst [vmem:[%s1948_s29 + $0x4] sm:$0xf] %v614_v61  ;;  %v626_v3 = vld [vmem:[%s1943_s17 + $0x38] sm:$0xf]  ;;  %v628_v4 = vld [vmem:[%s1943_s17 + $0x40] sm:$0xf] }
  0x61   : > { %617 = vst [vmem:[%s1948_s29 + $0x8] sm:$0xf] %v616_v62  ;;  %v630_v5 = vld [vmem:[%s1943_s17 + $0x48] sm:$0xf]  ;;  %v632_v6 = vld [vmem:[%s1943_s17 + $0x50] sm:$0xf] }
  0x62   : > { %619 = vst [vmem:[%s1948_s29 + $0xc] sm:$0xf] %v618_v63  ;;  %v634_v7 = vld [vmem:[%s1943_s17 + $0x58] sm:$0xf]  ;;  %v636_v8 = vld [vmem:[%s1943_s17 + $0x60] sm:$0xf] }
  0x63   : > { %621 = vst [vmem:[%s1948_s29 + $0x10] sm:$0xf] %v620_v0  ;;  %v638_v9 = vld [vmem:[%s1943_s17 + $0x68] sm:$0xf]  ;;  %v640_v10 = vld [vmem:[%s1943_s17 + $0x70] sm:$0xf] }
  0x64   : > { %623 = vst [vmem:[%s1948_s29 + $0x14] sm:$0xf] %v622_v1  ;;  %v642_v11 = vld [vmem:[%s1943_s17 + $0x78] sm:$0xf]  ;;  %v644_v12 = vld [vmem:[%s1943_s17 + $0x80] sm:$0xf] }
  0x65   : > { %625 = vst [vmem:[%s1948_s29 + $0x18] sm:$0xf] %v624_v2  ;;  %v646_v13 = vld [vmem:[%s1943_s17 + $0x88] sm:$0xf]  ;;  %v648_v14 = vld [vmem:[%s1943_s17 + $0x90] sm:$0xf] }
  0x66   : > { %627 = vst [vmem:[%s1948_s29 + $0x1c] sm:$0xf] %v626_v3  ;;  %v650_v15 = vld [vmem:[%s1943_s17 + $0x98] sm:$0xf] }
  0x67   : > { %629 = vst [vmem:[%s1948_s29 + $0x20] sm:$0xf] %v628_v4 }
  0x68   : > { %631 = vst [vmem:[%s1948_s29 + $0x24] sm:$0xf] %v630_v5 }
  0x69   : > { %633 = vst [vmem:[%s1948_s29 + $0x28] sm:$0xf] %v632_v6 }
  0x6a   : > { %635 = vst [vmem:[%s1948_s29 + $0x2c] sm:$0xf] %v634_v7 }
  0x6b   : > { %637 = vst [vmem:[%s1948_s29 + $0x30] sm:$0xf] %v636_v8 }
  0x6c   : > { %639 = vst [vmem:[%s1948_s29 + $0x34] sm:$0xf] %v638_v9 }
  0x6d   : > { %641 = vst [vmem:[%s1948_s29 + $0x38] sm:$0xf] %v640_v10 }
  0x6e   : > { %643 = vst [vmem:[%s1948_s29 + $0x3c] sm:$0xf] %v642_v11 }
  0x6f   : > { %645 = vst [vmem:[%s1948_s29 + $0x40] sm:$0xf] %v644_v12 }
  0x70   : > { %647 = vst [vmem:[%s1948_s29 + $0x44] sm:$0xf] %v646_v13 }
  0x71   : > { %649 = vst [vmem:[%s1948_s29 + $0x48] sm:$0xf] %v648_v14 }
  0x72   : > { %651 = vst [vmem:[%s1948_s29 + $0x4c] sm:$0xf] %v650_v15 }
  0x73 PF: > { %p1428_p7 = scmp.ge.s32.totalorder %s1706_s23, 1  ;;  %p714_p8 = scmp.lt.s32.totalorder %s1706_s23, 3 }
  0x75   : > { %p715_p9 = pnand %p1428_p7, %p714_p8 }
  0x76   : > { %s721_s18 = sand.u32 (!%p715_p9), 1, %s1698_s21  }
  0x77   : > { %718 = sbr.rel (%p715_p9) target bundleno = 339 (0x153), region = 192 }
  0x78   : > { %s1657_s19 = smul.u32 (!%p715_p9), 80, %s721_s18 }
  0x7a   : > { %s1992_s20 = scalar_lea.vmem (!%p715_p9), [#allocation2], %s1657_s19  ;;  %s1996_s26 = scalar_lea.vmem (!%p715_p9), [#allocation3], %s1657_s19 }
  0x7b   : > { %s2007_s10 = scalar_lea.vmem (!%p715_p9), [#allocation4], %s1657_s19  ;;  %s2013_s11 = scalar_lea.vmem (!%p715_p9), [#allocation5], %s1657_s19 }
  0x7c   : > { %v1615_v16 = vld [vmem:[%s1992_s20 + $0x38] sm:$0xff]  ;;  %v1617_v17 = vld [vmem:[%s1992_s20 + $0x48] sm:$0xff]  ;;  %v1606_v19 = vld [vmem:[%s2091_s4 + $0x4] sm:$0xf]  ;;  %vm874_vm0 = vcmask 261120   ;;  %v1708_v45 = vmov 0  }
  0x7d   : > { %v1625_v18 = vld [vmem:[%s1996_s26 + $0x38] sm:$0xff]  ;;  %878 = vmatpush.bf16.msra.mxu0 %v1615_v16  ;;  %898 = vmatpush.bf16.msra.mxu1 %v1617_v17  ;;  %v1614_v21 = vld [vmem:[%s1992_s20 + $0x30] sm:$0xff]  ;;  %v1616_v22 = vld [vmem:[%s1992_s20 + $0x40] sm:$0xff]  ;;  %s1603_s27 = sshll.u32 (%p1778_p5), %s1420_s24, 2 }
  0x7e   : > { %v1434_v20 = vld [vmem:[%s2091_s4 + $0x8] sm:$0xf0]  ;;  %986 = vmatpush.bf16.msra.mxu2 %v1625_v18  ;;  %v1624_v24 = vld [vmem:[%s1996_s26 + $0x30] sm:$0xff]  ;;  %v1636_v26 = vld [vmem:[%s2007_s10 + $0x40] sm:$0xff]  ;;  %1683 = vset.pattern.permute.xlu0 %v1708_v45  ;;  %s1264_s9 = scalar_lea.vmem (%p1778_p5), %s2093_s6, %s1603_s27 }
  0x7f   : > { %v1637_v23 = vld [vmem:[%s2007_s10 + $0x48] sm:$0xff]  ;;  %v1635_v25 = vld [vmem:[%s2007_s10 + $0x38] sm:$0xff]  ;;  %v2016_v28 = vor.u32 %v1606_v19, %v1434_v20  ;;  %v1634_v31 = vld [vmem:[%s2007_s10 + $0x30] sm:$0xff] }
  0x80   : > { %1116 = vmatpush.bf16.msra.mxu3 %v1637_v23  ;;  %v1645_v27 = vld [vmem:[%s2013_s11 + $0x38] sm:$0xff]  ;;  %v1613_v29 = vld [vmem:[%s1992_s20 + $0x28] sm:$0xff]  ;;  %v1644_v32 = vld [vmem:[%s2013_s11 + $0x30] sm:$0xff] }
  0x81   : > { %879 = vmatpush.bf16.msra.mxu0 %v1614_v21  ;;  %899 = vmatpush.bf16.msra.mxu1 %v1616_v22  ;;  %v1623_v30 = vld [vmem:[%s1996_s26 + $0x28] sm:$0xff]  ;;  %v1612_v33 = vld [vmem:[%s1992_s20 + $0x20] sm:$0xff]  ;;  %v1611_v37 = vld [vmem:[%s1992_s20 + $0x18] sm:$0xff] }
  0x82   : > { %987 = vmatpush.bf16.msra.mxu2 %v1624_v24  ;;  %v1622_v34 = vld [vmem:[%s1996_s26 + $0x20] sm:$0xff]  ;;  %v1633_v35 = vld [vmem:[%s2007_s10 + $0x28] sm:$0xff]  ;;  %v1621_v38 = vld [vmem:[%s1996_s26 + $0x18] sm:$0xff] }
  0x83   : > { %v1643_v36 = vld [vmem:[%s2013_s11 + $0x28] sm:$0xff]  ;;  %v1632_v39 = vld [vmem:[%s2007_s10 + $0x20] sm:$0xff]  ;;  %v1610_v41 = vld [vmem:[%s1992_s20 + $0x10] sm:$0xff] }
  0x84   : > { %1117 = vmatpush.bf16.msra.mxu3 %v1636_v26  ;;  %1478 = vmatmul.msk.bf16.vlgmr.msra.gmra.mxu1 %vm874_vm0, %v2016_v28  ;;  %v1642_v40 = vld [vmem:[%s2013_s11 + $0x20] sm:$0xff]  ;;  %v1620_v43 = vld [vmem:[%s1996_s26 + $0x10] sm:$0xff]  ;;  %v1631_v44 = vld [vmem:[%s2007_s10 + $0x18] sm:$0xff] }
  0x85   : > { %1096 = vmatpush.bf16.msrb.mxu1 %v1635_v25  ;;  %880 = vmatpush.bf16.msra.mxu0 %v1613_v29  ;;  %v1236_v42 = vld [vmem:[%s2092_s5] sm:$0xff]  ;;  %v1641_v46 = vld [vmem:[%s2013_s11 + $0x18] sm:$0xff]  ;;  %v1609_v47 = vld [vmem:[%s1992_s20 + $0x8] sm:$0xff] }
  0x86   : > { %988 = vmatpush.bf16.msra.mxu2 %v1623_v30  ;;  %1240 = vperm.xlu0 %1683, %v1236_v42   ;;  %v1619_v48 = vld [vmem:[%s1996_s26 + $0x8] sm:$0xff]  ;;  %v1630_v49 = vld [vmem:[%s2007_s10 + $0x10] sm:$0xff]  ;;  %v1608_v52 = vld [vmem:[%s1992_s20] sm:$0xff]  ;;  %s1429_s20 = sshll.u32 %s721_s18, 3 }
  0x87   : > { %1560 = vmatmul.msk.bf16.vlgmr.msra.gmra.mxu3 %vm874_vm0, %v2016_v28  ;;  %v1432_v50 = vld [vmem:[%s2091_s4] sm:$0xf]  ;;  %v1607_v53 = vld [vmem:[%s2091_s4 + $0x4] sm:$0xf0] }
  0x88   : > { %1206 = vmatpush.bf16.msrb.mxu3 %v1645_v27  ;;  %v1640_v51 = vld [vmem:[%s2013_s11 + $0x10] sm:$0xff]  ;;  %v1237_v54 = vld [vmem:[%s2092_s5 + $0x8] sm:$0xff]  ;;  %v1618_v55 = vld [vmem:[%s1996_s26] sm:$0xff]  ;;  %v1433_v59 = vor.u32 %v1607_v53, %v1432_v50 }
  0x89   : > { %1097 = vmatpush.bf16.msrb.mxu1 %v1634_v31  ;;  %881 = vmatpush.bf16.msra.mxu0 %v1612_v33  ;;  %v1629_v56 = vld [vmem:[%s2007_s10 + $0x8] sm:$0xff]  ;;  %v1628_v61 = vld [vmem:[%s2007_s10] sm:$0xff] }
  0x8a   : > { %989 = vmatpush.bf16.msra.mxu2 %v1622_v34  ;;  %v1627_v57 = vld [vmem:[%s1996_s26 + $0x48] sm:$0xff]  ;;  %v1626_v62 = vld [vmem:[%s1996_s26 + $0x40] sm:$0xff]  ;;  %s781_s26 = scalar_lea.vmem [#allocation6], %s1429_s20 }
  0x8b   : > { %v1647_v58 = vld [vmem:[%s2013_s11 + $0x48] sm:$0xff]  ;;  %v1646_v63 = vld [vmem:[%s2013_s11 + $0x40] sm:$0xff] }
  0x8c   : > { %1207 = vmatpush.bf16.msrb.mxu3 %v1644_v32  ;;  %v1639_v60 = vld [vmem:[%s2013_s11 + $0x8] sm:$0xff]  ;;  %v1638_v0 = vld [vmem:[%s2013_s11] sm:$0xff] }
  0x8d   : > { %1098 = vmatpush.bf16.msrb.mxu1 %v1633_v35  ;;  %882 = vmatpush.bf16.msra.mxu0 %v1611_v37 }
  0x8e   : > { %990 = vmatpush.bf16.msra.mxu2 %v1621_v38  ;;  %1245 = vperm.xlu0 %1683, %v1237_v54  }
  0x90   : > { %1208 = vmatpush.bf16.msrb.mxu3 %v1643_v36 }
  0x91   : > { %1099 = vmatpush.bf16.msrb.mxu1 %v1632_v39  ;;  %883 = vmatpush.bf16.msra.mxu0 %v1610_v41 }
  0x92   : > { %991 = vmatpush.bf16.msra.mxu2 %v1620_v43 }
  0x94   : > { %1209 = vmatpush.bf16.msrb.mxu3 %v1642_v40 }
  0x95   : > { %1100 = vmatpush.bf16.msrb.mxu1 %v1631_v44  ;;  %884 = vmatpush.bf16.msra.mxu0 %v1609_v47 }
  0x96   : > { %992 = vmatpush.bf16.msra.mxu2 %v1619_v48 }
  0x98   : > { %1210 = vmatpush.bf16.msrb.mxu3 %v1641_v46 }
  0x99   : > { %1101 = vmatpush.bf16.msrb.mxu1 %v1630_v49  ;;  %885 = vmatpush.bf16.msra.mxu0 %v1608_v52 }
  0x9a   : > { %993 = vmatpush.bf16.msra.mxu2 %v1618_v55 }
  0x9c   : > { %1211 = vmatpush.bf16.msrb.mxu3 %v1640_v51  ;;  %886 = vmatmul.bf16.vlgmr.msra.gmra.mxu0 %v1433_v59 }
  0x9d   : > { %1102 = vmatpush.bf16.msrb.mxu1 %v1629_v56  ;;  %1226 = vmatpush.bf16.msrb.mxu0 %v1647_v58 }
  0x9e   : > { %1006 = vmatpush.bf16.msrb.mxu2 %v1627_v57 }
  0x9f   : > { %994 = vmatmul.bf16.vlgmr.msra.gmra.mxu2 %v1433_v59 }
  0xa0   : > { %1212 = vmatpush.bf16.msrb.mxu3 %v1639_v60 }
  0xa1   : > { %1103 = vmatpush.bf16.msrb.mxu1 %v1628_v61  ;;  %1227 = vmatpush.bf16.msrb.mxu0 %v1646_v63 }
  0xa2   : > { %1007 = vmatpush.bf16.msrb.mxu2 %v1626_v62 }
  0xa4   : > { %1213 = vmatpush.bf16.msrb.mxu3 %v1638_v0  ;;  %1104 = vmatmul.bf16.vlgmr.msrb.gmra.mxu1 %v1433_v59 }
  0xa7   : > { %1214 = vmatmul.bf16.vlgmr.msrb.gmra.mxu3 %v1433_v59 }
  0xac   : > { %1601 = vmatmul.msk.bf16.vlgmr.msrb.gmra.mxu0 %vm874_vm0, %v2016_v28 }
  0xaf   : > { %1519 = vmatmul.msk.bf16.vlgmr.msrb.gmra.mxu2 %vm874_vm0, %v2016_v28 }
  0xf8   : > { %v1241_v17 = vpop.permute.xlu0 %1240 }
 0x100   : > { %v1246_v33 = vpop.permute.xlu0 %1245 }
 0x101   : > { %v901_v1 = vpop.f32.mrf.mxu1 }
 0x109   : > { %v903_v5 = vpop.f32.mrf.mxu1 }
 0x10a   : > { %v1119_v2 = vpop.f32.mrf.mxu3 }
 0x112   : > { %v1121_v6 = vpop.f32.mrf.mxu3 }
 0x119   : > { %v887_v3 = vpop.f32.mrf.mxu0 }
 0x11a   : > { %v902_v13 = vadd.f32 %v901_v1, %v887_v3 }
 0x121   : > { %v889_v7 = vpop.f32.mrf.mxu0  ;;  %v1105_v9 = vpop.f32.mrf.mxu1 }
 0x122   : > { %v995_v4 = vpop.f32.mrf.mxu2  ;;  %v1120_v16 = vadd.f32 %v1119_v2, %v1105_v9  ;;  %v904_v22 = vadd.f32 %v903_v5, %v889_v7 }
 0x129   : > { %v1229_v11 = vpop.f32.mrf.mxu0  ;;  %v1107_v20 = vpop.f32.mrf.mxu1 }
 0x12a   : > { %v997_v8 = vpop.f32.mrf.mxu2  ;;  %v1215_v10 = vpop.f32.mrf.mxu3  ;;  %v1122_v26 = vadd.f32 %v1121_v6, %v1107_v20 }
 0x12b   : > { %v1230_v18 = vadd.f32 %v1229_v11, %v1215_v10 }
 0x131   : > { %v1231_v25 = vpop.f32.mrf.mxu0 }
 0x132   : > { %v1009_v12 = vpop.f32.mrf.mxu2  ;;  %v1217_v24 = vpop.f32.mrf.mxu3 }
 0x133   : > { %v1010_v14 = vadd.f32 %v1009_v12, %v995_v4  ;;  %v1232_v29 = vadd.f32 %v1231_v25, %v1217_v24 }
 0x135   : > { %v1014_v15 = vmax.f32 %v902_v13, %v1010_v14 }
 0x137   : > { %v1124_v19 = vmax.f32 %v1014_v15, %v1120_v16 }
 0x139   : > { %v1234_v27 = vmax.f32 %v1124_v19, %v1230_v18 }
 0x13a   : > { %v1011_v21 = vpop.f32.mrf.mxu2 }
 0x13b   : > { %v1012_v23 = vadd.f32 %v1011_v21, %v997_v8  ;;  %v1248_v31 = vadd.f32 %v1241_v17, %v1234_v27 }
 0x13d   : > { %v1015_v28 = vmax.f32 %v904_v22, %v1012_v23  ;;  %v1250_v35 = vmax.f32 %v1248_v31, 0.0 }
 0x13f   : > { %v1125_v30 = vmax.f32 %v1015_v28, %v1122_v26 }
 0x141   : > { %v1235_v32 = vmax.f32 %v1125_v30, %v1232_v29 }
 0x143   : > { %v1249_v34 = vadd.f32 %v1246_v33, %v1235_v32 }
 0x145   : > { %v1251_v36 = vmax.f32 %v1249_v34, 0.0  ;;  %1262 = sbr.rel (!%p1778_p5) target bundleno = 339 (0x153), region = 212 }
 0x147   : > { %v1651_v37 = vpack.c.bf16 %v1251_v36, %v1250_v35 }
 0x149   : > { %1652 = vst [vmem:[%s781_s26] sm:$0xff] %v1651_v37  }
 0x150   : > { %v1281_v38 = vld [vmem:[%s781_s26] sm:$0xf]  ;;  %v1283_v39 = vld [vmem:[%s781_s26 + $0x4] sm:$0xf] }
 0x151   : > { %1282 = vst [vmem:[%s1264_s9] sm:$0xf] %v1281_v38 }
 0x152   : > { %1284 = vst [vmem:[%s1264_s9 + $0x8] sm:$0xf] %v1283_v39 }
 0x153 PF: > { %p13_p10 = scmp.ge.s32.totalorder %s1761_s25, 4   ;;  %s2096_s21 = smov %s1702_s22 }
 0x154   : > { %s2097_s22 = smov %s1772_s28  ;;  %s2098_s23 = smov %s1761_s25 }
 0x155   :  { %15 = sbr.rel (!%p13_p10) target bundleno = 2 (0x2), region = 308 }

// kernel: femnist_cnn_forward.5
= control target key start
LH: loop header
LB: loop body
LE: loop exit
PB: predicated region body
PF: predicated region fallthrough
CT: control target
= control target key end

     0   :  { %s1277_s24 = smov 0   ;;  %s1476_s0 = inlined_call_operand.vmem [shape: bf16[256,256], index: 0, kind: input, shape index: {}]   ;;  %s1477_s1 = inlined_call_operand.vmem [shape: bf16[256,128], index: 1, kind: input, shape index: {}]   ;;  %s1478_s2 = inlined_call_operand.vmem [shape: f32[1,128], index: 2, kind: input, shape index: {}]   ;;  %s1479_s3 = inlined_call_operand.vmem [shape: bf16[128,128], index: 3, kind: input, shape index: {}]   ;;  %s1480_s4 = inlined_call_operand.vmem [shape: f32[1,128], index: 4, kind: input, shape index: {}]   ;;  %s1481_s5 = inlined_call_operand.vmem [shape: bf16[128,128], index: 5, kind: input, shape index: {}]   ;;  %s1482_s6 = inlined_call_operand.vmem [shape: f32[1,128], index: 6, kind: input, shape index: {}]   ;;  %s1483_s7 = inlined_call_operand.vmem [shape: f32[256,128], index: 7, kind: output, shape index: {}]  }
   0x1 LB: > { %s965_s25 = sadd.s32 4294967295, %s1235_s24   ;;  %p969_p0 = scmp.ge.s32.totalorder %s1235_s24, 1  ;;  %s1235_s24 = sphi %s1277_s24, %s17_s24  }
   0x2   : > { %p239_p1 = scmp.lt.s32.totalorder %s1235_s24, 3 }
   0x4   : > { %p240_p2 = pnand %p969_p0, %p239_p1 }
   0x5   : > { %s970_s15 = sshll.u32 (!%p240_p2), %s965_s25, 4 }
   0x6   : > { %243 = sbr.rel (%p240_p2) target bundleno = 586 (0x24a), region = 48  ;;  %p273_p3 = scmp.lt.s32.totalorder (!%p240_p2), %s970_s15, 31 }
   0xb   : > { %v1193_v0 = vld [vmem:[%s1477_s1 + $0x38] sm:$0xff]  ;;  %v1192_v2 = vld [vmem:[%s1477_s1 + $0x30] sm:$0xff]  ;;  %v1191_v4 = vld [vmem:[%s1477_s1 + $0x28] sm:$0xff]  ;;  %s1485_s15 = smov (!%p273_p3, %s970_s15), 31 }
   0xc   : > { %v1201_v1 = vld [vmem:[%s1477_s1 + $0x78] sm:$0xff]  ;;  %513 = vmatpush.bf16.msra.mxu0 %v1193_v0  ;;  %v1200_v3 = vld [vmem:[%s1477_s1 + $0x70] sm:$0xff]  ;;  %v1199_v5 = vld [vmem:[%s1477_s1 + $0x68] sm:$0xff]  ;;  %s1169_s29 = sshll.u32 %s1485_s15, 3 }
   0xd   : > { %562 = vmatpush.bf16.msra.mxu1 %v1201_v1  ;;  %v1190_v6 = vld [vmem:[%s1477_s1 + $0x20] sm:$0xff]  ;;  %v1189_v8 = vld [vmem:[%s1477_s1 + $0x18] sm:$0xff]  ;;  %v1188_v10 = vld [vmem:[%s1477_s1 + $0x10] sm:$0xff]  ;;  %s1335_s13 = scalar_lea.vmem %s1476_s0, %s1169_s29  ;;  %s1455_s19 = scalar_lea.vmem %s1483_s7, %s1169_s29 }
   0xe   : > { %v1198_v7 = vld [vmem:[%s1477_s1 + $0x60] sm:$0xff]  ;;  %v1197_v9 = vld [vmem:[%s1477_s1 + $0x58] sm:$0xff]  ;;  %v1196_v11 = vld [vmem:[%s1477_s1 + $0x50] sm:$0xff] }
   0xf   : > { %v1187_v12 = vld [vmem:[%s1477_s1 + $0x8] sm:$0xff]  ;;  %v1186_v14 = vld [vmem:[%s1477_s1] sm:$0xff]  ;;  %v985_v22 = vld [vmem:[%s1335_s13 + $0x10] sm:$0xf] }
  0x10   : > { %514 = vmatpush.bf16.msra.mxu0 %v1192_v2  ;;  %v1195_v13 = vld [vmem:[%s1477_s1 + $0x48] sm:$0xff]  ;;  %v1194_v15 = vld [vmem:[%s1477_s1 + $0x40] sm:$0xff]  ;;  %v1173_v23 = vld [vmem:[%s1335_s13 + $0x14] sm:$0xf0] }
  0x11   : > { %563 = vmatpush.bf16.msra.mxu1 %v1200_v3  ;;  %v977_v16 = vld [vmem:[%s1335_s13] sm:$0xf]  ;;  %v1171_v17 = vld [vmem:[%s1335_s13 + $0x4] sm:$0xf0]  ;;  %v1170_v18 = vld [vmem:[%s1335_s13 + $0x4] sm:$0xf]  ;;  %v986_v26 = vor.u32 %v1173_v23, %v985_v22 }
  0x12   : > { %v979_v19 = vld [vmem:[%s1335_s13 + $0x8] sm:$0xf0]  ;;  %v978_v20 = vor.u32 %v1171_v17, %v977_v16  ;;  %v1172_v24 = vld [vmem:[%s1335_s13 + $0x14] sm:$0xf]  ;;  %v987_v25 = vld [vmem:[%s1335_s13 + $0x18] sm:$0xf0] }
  0x13   : > { %v982_v21 = vor.u32 %v1170_v18, %v979_v19  ;;  %v990_v27 = vor.u32 %v1172_v24, %v987_v25  ;;  %v993_v28 = vld [vmem:[%s1335_s13 + $0x20] sm:$0xf]  ;;  %v1175_v29 = vld [vmem:[%s1335_s13 + $0x24] sm:$0xf0]  ;;  %v1174_v30 = vld [vmem:[%s1335_s13 + $0x24] sm:$0xf] }
  0x14   : > { %515 = vmatpush.bf16.msra.mxu0 %v1191_v4  ;;  %v995_v31 = vld [vmem:[%s1335_s13 + $0x28] sm:$0xf0]  ;;  %v994_v32 = vor.u32 %v1175_v29, %v993_v28  ;;  %v1001_v34 = vld [vmem:[%s1335_s13 + $0x30] sm:$0xf]  ;;  %v1177_v35 = vld [vmem:[%s1335_s13 + $0x34] sm:$0xf0] }
  0x15   : > { %564 = vmatpush.bf16.msra.mxu1 %v1199_v5  ;;  %v998_v33 = vor.u32 %v1174_v30, %v995_v31  ;;  %v1176_v36 = vld [vmem:[%s1335_s13 + $0x34] sm:$0xf]  ;;  %v1003_v37 = vld [vmem:[%s1335_s13 + $0x38] sm:$0xf0]  ;;  %v1002_v38 = vor.u32 %v1177_v35, %v1001_v34  ;;  %v1009_v40 = vld [vmem:[%s1335_s13 + $0x40] sm:$0xf] }
  0x16   : > { %v1006_v39 = vor.u32 %v1176_v36, %v1003_v37  ;;  %v1179_v41 = vld [vmem:[%s1335_s13 + $0x44] sm:$0xf0]  ;;  %v1178_v42 = vld [vmem:[%s1335_s13 + $0x44] sm:$0xf]  ;;  %v1011_v43 = vld [vmem:[%s1335_s13 + $0x48] sm:$0xf0] }
  0x17   : > { %v1010_v44 = vor.u32 %v1179_v41, %v1009_v40  ;;  %v1014_v45 = vor.u32 %v1178_v42, %v1011_v43  ;;  %v1209_v46 = vld [vmem:[%s1479_s3 + $0x38] sm:$0xff]  ;;  %v1017_v47 = vld [vmem:[%s1335_s13 + $0x50] sm:$0xf]  ;;  %v1180_v49 = vld [vmem:[%s1335_s13 + $0x54] sm:$0xf] }
  0x18   : > { %516 = vmatpush.bf16.msra.mxu0 %v1190_v6  ;;  %703 = vmatpush.bf16.msra.mxu2 %v1209_v46  ;;  %v1181_v48 = vld [vmem:[%s1335_s13 + $0x54] sm:$0xf0]  ;;  %v1019_v50 = vld [vmem:[%s1335_s13 + $0x58] sm:$0xf0]  ;;  %v1208_v53 = vld [vmem:[%s1479_s3 + $0x30] sm:$0xff] }
  0x19   : > { %565 = vmatpush.bf16.msra.mxu1 %v1198_v7  ;;  %v1018_v51 = vor.u32 %v1181_v48, %v1017_v47  ;;  %v1022_v52 = vor.u32 %v1180_v49, %v1019_v50  ;;  %v1207_v54 = vld [vmem:[%s1479_s3 + $0x28] sm:$0xff]  ;;  %v1206_v55 = vld [vmem:[%s1479_s3 + $0x20] sm:$0xff]  ;;  %v1205_v62 = vld [vmem:[%s1479_s3 + $0x18] sm:$0xff] }
  0x1a   : > { %v1025_v56 = vld [vmem:[%s1335_s13 + $0x60] sm:$0xf]  ;;  %v1183_v57 = vld [vmem:[%s1335_s13 + $0x64] sm:$0xf0]  ;;  %v1182_v58 = vld [vmem:[%s1335_s13 + $0x64] sm:$0xf] }
  0x1b   : > { %v1027_v59 = vld [vmem:[%s1335_s13 + $0x68] sm:$0xf0]  ;;  %v1026_v60 = vor.u32 %v1183_v57, %v1025_v56  ;;  %v1204_v63 = vld [vmem:[%s1479_s3 + $0x10] sm:$0xff]  ;;  %v1185_v2 = vld [vmem:[%s1335_s13 + $0x74] sm:$0xf0] }
  0x1c   : > { %517 = vmatpush.bf16.msra.mxu0 %v1189_v8  ;;  %704 = vmatpush.bf16.msra.mxu2 %v1208_v53  ;;  %v1030_v61 = vor.u32 %v1182_v58, %v1027_v59  ;;  %v1203_v0 = vld [vmem:[%s1479_s3 + $0x8] sm:$0xff]  ;;  %v1033_v1 = vld [vmem:[%s1335_s13 + $0x70] sm:$0xf]  ;;  %v1184_v3 = vld [vmem:[%s1335_s13 + $0x74] sm:$0xf] }
  0x1d   : > { %566 = vmatpush.bf16.msra.mxu1 %v1197_v9  ;;  %v1035_v4 = vld [vmem:[%s1335_s13 + $0x78] sm:$0xf0]  ;;  %v1202_v5 = vld [vmem:[%s1479_s3] sm:$0xff]  ;;  %v1034_v6 = vor.u32 %v1185_v2, %v1033_v1 }
  0x1e   : > { %v1038_v7 = vor.u32 %v1184_v3, %v1035_v4 }
  0x20   : > { %518 = vmatpush.bf16.msra.mxu0 %v1188_v10  ;;  %705 = vmatpush.bf16.msra.mxu2 %v1207_v54  ;;  %v1402_v10 = vld [vmem:[%s1478_s2] ss:$0 sm:$0xff] }
  0x21   : > { %567 = vmatpush.bf16.msra.mxu1 %v1196_v11 }
  0x24   : > { %519 = vmatpush.bf16.msra.mxu0 %v1187_v12  ;;  %706 = vmatpush.bf16.msra.mxu2 %v1206_v55 }
  0x25   : > { %568 = vmatpush.bf16.msra.mxu1 %v1195_v13 }
  0x28   : > { %520 = vmatpush.bf16.msra.mxu0 %v1186_v14  ;;  %707 = vmatpush.bf16.msra.mxu2 %v1205_v62 }
  0x29   : > { %569 = vmatpush.bf16.msra.mxu1 %v1194_v15 }
  0x2b   : > { %521 = vmatmul.bf16.vlgmr.msra.gmra.mxu0 %v978_v20 }
  0x2c   : > { %570 = vmatmul.bf16.vlgmr.msra.gmra.mxu1 %v982_v21  ;;  %708 = vmatpush.bf16.msra.mxu2 %v1204_v63 }
  0x30   : > { %709 = vmatpush.bf16.msra.mxu2 %v1203_v0 }
  0x34   : > { %710 = vmatpush.bf16.msra.mxu2 %v1202_v5 }
  0x3b   : > { %526 = vmatmul.bf16.gmra.mxu0 %v986_v26 }
  0x3c   : > { %575 = vmatmul.bf16.gmra.mxu1 %v990_v27 }
  0x4b   : > { %531 = vmatmul.bf16.gmra.mxu0 %v994_v32 }
  0x4c   : > { %580 = vmatmul.bf16.gmra.mxu1 %v998_v33 }
  0x5b   : > { %536 = vmatmul.bf16.gmra.mxu0 %v1002_v38 }
  0x5c   : > { %585 = vmatmul.bf16.gmra.mxu1 %v1006_v39 }
  0x6b   : > { %541 = vmatmul.bf16.gmra.mxu0 %v1010_v44 }
  0x6c   : > { %590 = vmatmul.bf16.gmra.mxu1 %v1014_v45 }
  0x7b   : > { %546 = vmatmul.bf16.gmra.mxu0 %v1018_v51 }
  0x7c   : > { %595 = vmatmul.bf16.gmra.mxu1 %v1022_v52 }
  0x8b   : > { %551 = vmatmul.bf16.gmra.mxu0 %v1026_v60 }
  0x8c   : > { %600 = vmatmul.bf16.gmra.mxu1 %v1030_v61 }
  0x9b   : > { %556 = vmatmul.bf16.gmra.mxu0 %v1034_v6 }
  0x9c   : > { %605 = vmatmul.bf16.gmra.mxu1 %v1038_v7 }
  0xa8   : > { %v522_v8 = vpop.f32.mrf.mxu0 }
  0xa9   : > { %v571_v9 = vpop.f32.mrf.mxu1  ;;  %v523_v11 = vadd.f32 %v1402_v10, %v522_v8 }
  0xab   : > { %v572_v14 = vadd.f32 %v571_v9, %v523_v11 }
  0xad   : > { %v611_v17 = vmax.f32 %v572_v14, 0.0  ;;  %v1217_v14 = vld [vmem:[%s1481_s5 + $0x38] sm:$0xff] }
  0xae   : > { %844 = vmatpush.bf16.msra.mxu3 %v1217_v14 }
  0xb0   : > { %v524_v12 = vpop.f32.mrf.mxu0 }
  0xb1   : > { %v573_v13 = vpop.f32.mrf.mxu1  ;;  %v525_v15 = vadd.f32 %v1402_v10, %v524_v12 }
  0xb3   : > { %v574_v16 = vadd.f32 %v573_v13, %v525_v15  ;;  %v1216_v15 = vld [vmem:[%s1481_s5 + $0x30] sm:$0xff] }
  0xb4   : > { %845 = vmatpush.bf16.msra.mxu3 %v1216_v15 }
  0xb5   : > { %v612_v18 = vmax.f32 %v574_v16, 0.0 }
  0xb7   : > { %v627_v19 = vpack.c.bf16 %v612_v18, %v611_v17  ;;  %v1215_v17 = vld [vmem:[%s1481_s5 + $0x28] sm:$0xff] }
  0xb8   : > { %v527_v20 = vpop.f32.mrf.mxu0  ;;  %846 = vmatpush.bf16.msra.mxu3 %v1215_v17 }
  0xb9   : > { %v576_v21 = vpop.f32.mrf.mxu1  ;;  %711 = vmatmul.bf16.vlgmr.msra.gmra.mxu2 %v627_v19  ;;  %v528_v22 = vadd.f32 %v1402_v10, %v527_v20 }
  0xbb   : > { %v577_v25 = vadd.f32 %v576_v21, %v528_v22 }
  0xbd   : > { %v613_v28 = vmax.f32 %v577_v25, 0.0 }
  0xc0   : > { %v529_v23 = vpop.f32.mrf.mxu0 }
  0xc1   : > { %v578_v24 = vpop.f32.mrf.mxu1  ;;  %v530_v26 = vadd.f32 %v1402_v10, %v529_v23  ;;  %v1214_v23 = vld [vmem:[%s1481_s5 + $0x20] sm:$0xff] }
  0xc2   : > { %847 = vmatpush.bf16.msra.mxu3 %v1214_v23 }
  0xc3   : > { %v579_v27 = vadd.f32 %v578_v24, %v530_v26 }
  0xc5   : > { %v614_v29 = vmax.f32 %v579_v27, 0.0 }
  0xc7   : > { %v628_v30 = vpack.c.bf16 %v614_v29, %v613_v28  ;;  %v1213_v29 = vld [vmem:[%s1481_s5 + $0x18] sm:$0xff] }
  0xc8   : > { %v532_v31 = vpop.f32.mrf.mxu0  ;;  %848 = vmatpush.bf16.msra.mxu3 %v1213_v29 }
  0xc9   : > { %v581_v32 = vpop.f32.mrf.mxu1  ;;  %716 = vmatmul.bf16.gmra.mxu2 %v628_v30  ;;  %v533_v33 = vadd.f32 %v1402_v10, %v532_v31  ;;  %v1212_v31 = vld [vmem:[%s1481_s5 + $0x10] sm:$0xff] }
  0xcb   : > { %v582_v36 = vadd.f32 %v581_v32, %v533_v33 }
  0xcc   : > { %849 = vmatpush.bf16.msra.mxu3 %v1212_v31 }
  0xcd   : > { %v615_v39 = vmax.f32 %v582_v36, 0.0  ;;  %v1211_v36 = vld [vmem:[%s1481_s5 + $0x8] sm:$0xff] }
  0xd0   : > { %v534_v34 = vpop.f32.mrf.mxu0  ;;  %850 = vmatpush.bf16.msra.mxu3 %v1211_v36 }
  0xd1   : > { %v583_v35 = vpop.f32.mrf.mxu1  ;;  %v535_v37 = vadd.f32 %v1402_v10, %v534_v34 }
  0xd3   : > { %v584_v38 = vadd.f32 %v583_v35, %v535_v37 }
  0xd5   : > { %v616_v40 = vmax.f32 %v584_v38, 0.0 }
  0xd7   : > { %v629_v41 = vpack.c.bf16 %v616_v40, %v615_v39  ;;  %v1210_v40 = vld [vmem:[%s1481_s5] sm:$0xff] }
  0xd8   : > { %v537_v42 = vpop.f32.mrf.mxu0  ;;  %851 = vmatpush.bf16.msra.mxu3 %v1210_v40 }
  0xd9   : > { %v586_v43 = vpop.f32.mrf.mxu1  ;;  %721 = vmatmul.bf16.gmra.mxu2 %v629_v41  ;;  %v538_v44 = vadd.f32 %v1402_v10, %v537_v42 }
  0xdb   : > { %v587_v47 = vadd.f32 %v586_v43, %v538_v44 }
  0xdd   : > { %v617_v50 = vmax.f32 %v587_v47, 0.0 }
  0xe0   : > { %v539_v45 = vpop.f32.mrf.mxu0 }
  0xe1   : > { %v588_v46 = vpop.f32.mrf.mxu1  ;;  %v540_v48 = vadd.f32 %v1402_v10, %v539_v45 }
  0xe3   : > { %v589_v49 = vadd.f32 %v588_v46, %v540_v48 }
  0xe5   : > { %v618_v51 = vmax.f32 %v589_v49, 0.0 }
  0xe7   : > { %v630_v52 = vpack.c.bf16 %v618_v51, %v617_v50 }
  0xe8   : > { %v542_v53 = vpop.f32.mrf.mxu0 }
  0xe9   : > { %v591_v54 = vpop.f32.mrf.mxu1  ;;  %726 = vmatmul.bf16.gmra.mxu2 %v630_v52  ;;  %v543_v55 = vadd.f32 %v1402_v10, %v542_v53 }
  0xeb   : > { %v592_v58 = vadd.f32 %v591_v54, %v543_v55 }
  0xed   : > { %v619_v61 = vmax.f32 %v592_v58, 0.0 }
  0xf0   : > { %v544_v56 = vpop.f32.mrf.mxu0 }
  0xf1   : > { %v593_v57 = vpop.f32.mrf.mxu1  ;;  %v545_v59 = vadd.f32 %v1402_v10, %v544_v56 }
  0xf3   : > { %v594_v60 = vadd.f32 %v593_v57, %v545_v59 }
  0xf5   : > { %v620_v62 = vmax.f32 %v594_v60, 0.0 }
  0xf7   : > { %v631_v63 = vpack.c.bf16 %v620_v62, %v619_v61 }
  0xf8   : > { %v547_v0 = vpop.f32.mrf.mxu0 }
  0xf9   : > { %v596_v1 = vpop.f32.mrf.mxu1  ;;  %731 = vmatmul.bf16.gmra.mxu2 %v631_v63  ;;  %v548_v2 = vadd.f32 %v1402_v10, %v547_v0 }
  0xfb   : > { %v597_v5 = vadd.f32 %v596_v1, %v548_v2 }
  0xfd   : > { %v621_v8 = vmax.f32 %v597_v5, 0.0 }
 0x100   : > { %v549_v3 = vpop.f32.mrf.mxu0 }
 0x101   : > { %v598_v4 = vpop.f32.mrf.mxu1  ;;  %v550_v6 = vadd.f32 %v1402_v10, %v549_v3 }
 0x103   : > { %v599_v7 = vadd.f32 %v598_v4, %v550_v6 }
 0x105   : > { %v622_v9 = vmax.f32 %v599_v7, 0.0 }
 0x107   : > { %v632_v11 = vpack.c.bf16 %v622_v9, %v621_v8 }
 0x108   : > { %v552_v12 = vpop.f32.mrf.mxu0 }
 0x109   : > { %v601_v13 = vpop.f32.mrf.mxu1  ;;  %736 = vmatmul.bf16.gmra.mxu2 %v632_v11  ;;  %v553_v16 = vadd.f32 %v1402_v10, %v552_v12 }
 0x10b   : > { %v602_v20 = vadd.f32 %v601_v13, %v553_v16 }
 0x10d   : > { %v623_v24 = vmax.f32 %v602_v20, 0.0 }
 0x110   : > { %v554_v18 = vpop.f32.mrf.mxu0 }
 0x111   : > { %v603_v19 = vpop.f32.mrf.mxu1  ;;  %v555_v21 = vadd.f32 %v1402_v10, %v554_v18 }
 0x113   : > { %v604_v22 = vadd.f32 %v603_v19, %v555_v21 }
 0x115   : > { %v624_v25 = vmax.f32 %v604_v22, 0.0 }
 0x117   : > { %v633_v26 = vpack.c.bf16 %v624_v25, %v623_v24 }
 0x118   : > { %v557_v27 = vpop.f32.mrf.mxu0 }
 0x119   : > { %v606_v28 = vpop.f32.mrf.mxu1  ;;  %741 = vmatmul.bf16.gmra.mxu2 %v633_v26  ;;  %v558_v30 = vadd.f32 %v1402_v10, %v557_v27 }
 0x11b   : > { %v607_v33 = vadd.f32 %v606_v28, %v558_v30 }
 0x11d   : > { %v625_v38 = vmax.f32 %v607_v33, 0.0 }
 0x120   : > { %v559_v32 = vpop.f32.mrf.mxu0 }
 0x121   : > { %v560_v34 = vadd.f32 %v1402_v10, %v559_v32  ;;  %v608_v35 = vpop.f32.mrf.mxu1  ;;  %v1227_v10 = vld [vmem:[%s1480_s4] ss:$0 sm:$0xff] }
 0x123   : > { %v609_v37 = vadd.f32 %v608_v35, %v560_v34  ;;  %v1228_v35 = vld [vmem:[%s1482_s6] ss:$0 sm:$0xff] }
 0x125   : > { %v626_v39 = vmax.f32 %v609_v37, 0.0 }
 0x127   : > { %v634_v41 = vpack.c.bf16 %v626_v39, %v625_v38 }
 0x129   : > { %746 = vmatmul.bf16.gmra.mxu2 %v634_v41 }
 0x13c   : > { %v712_v42 = vpop.f32.mrf.mxu2 }
 0x13d   : > { %v713_v43 = vadd.f32 %v1227_v10, %v712_v42 }
 0x13f   : > { %v752_v46 = vmax.f32 %v713_v43, 0.0 }
 0x144   : > { %v714_v44 = vpop.f32.mrf.mxu2 }
 0x145   : > { %v715_v45 = vadd.f32 %v1227_v10, %v714_v44 }
 0x147   : > { %v753_v47 = vmax.f32 %v715_v45, 0.0 }
 0x149   : > { %v768_v48 = vpack.c.bf16 %v753_v47, %v752_v46 }
 0x14b   : > { %852 = vmatmul.bf16.vlgmr.msra.gmra.mxu3 %v768_v48 }
 0x14c   : > { %v717_v49 = vpop.f32.mrf.mxu2 }
 0x14d   : > { %v718_v50 = vadd.f32 %v1227_v10, %v717_v49 }
 0x14f   : > { %v754_v53 = vmax.f32 %v718_v50, 0.0 }
 0x154   : > { %v719_v51 = vpop.f32.mrf.mxu2 }
 0x155   : > { %v720_v52 = vadd.f32 %v1227_v10, %v719_v51 }
 0x157   : > { %v755_v54 = vmax.f32 %v720_v52, 0.0 }
 0x159   : > { %v769_v55 = vpack.c.bf16 %v755_v54, %v754_v53 }
 0x15b   : > { %857 = vmatmul.bf16.gmra.mxu3 %v769_v55 }
 0x15c   : > { %v722_v56 = vpop.f32.mrf.mxu2 }
 0x15d   : > { %v723_v57 = vadd.f32 %v1227_v10, %v722_v56 }
 0x15f   : > { %v756_v60 = vmax.f32 %v723_v57, 0.0 }
 0x164   : > { %v724_v58 = vpop.f32.mrf.mxu2 }
 0x165   : > { %v725_v59 = vadd.f32 %v1227_v10, %v724_v58 }
 0x167   : > { %v757_v61 = vmax.f32 %v725_v59, 0.0 }
 0x169   : > { %v770_v62 = vpack.c.bf16 %v757_v61, %v756_v60 }
 0x16b   : > { %862 = vmatmul.bf16.gmra.mxu3 %v770_v62 }
 0x16c   : > { %v727_v63 = vpop.f32.mrf.mxu2 }
 0x16d   : > { %v728_v0 = vadd.f32 %v1227_v10, %v727_v63 }
 0x16f   : > { %v758_v3 = vmax.f32 %v728_v0, 0.0 }
 0x174   : > { %v729_v1 = vpop.f32.mrf.mxu2 }
 0x175   : > { %v730_v2 = vadd.f32 %v1227_v10, %v729_v1 }
 0x177   : > { %v759_v4 = vmax.f32 %v730_v2, 0.0 }
 0x179   : > { %v771_v5 = vpack.c.bf16 %v759_v4, %v758_v3 }
 0x17b   : > { %867 = vmatmul.bf16.gmra.mxu3 %v771_v5 }
 0x17c   : > { %v732_v6 = vpop.f32.mrf.mxu2 }
 0x17d   : > { %v733_v7 = vadd.f32 %v1227_v10, %v732_v6 }
 0x17f   : > { %v760_v11 = vmax.f32 %v733_v7, 0.0 }
 0x184   : > { %v734_v8 = vpop.f32.mrf.mxu2 }
 0x185   : > { %v735_v9 = vadd.f32 %v1227_v10, %v734_v8 }
 0x187   : > { %v761_v12 = vmax.f32 %v735_v9, 0.0 }
 0x189   : > { %v772_v13 = vpack.c.bf16 %v761_v12, %v760_v11 }
 0x18b   : > { %872 = vmatmul.bf16.gmra.mxu3 %v772_v13 }
 0x18c   : > { %v737_v14 = vpop.f32.mrf.mxu2 }
 0x18d   : > { %v738_v15 = vadd.f32 %v1227_v10, %v737_v14 }
 0x18f   : > { %v762_v18 = vmax.f32 %v738_v15, 0.0 }
 0x194   : > { %v739_v16 = vpop.f32.mrf.mxu2 }
 0x195   : > { %v740_v17 = vadd.f32 %v1227_v10, %v739_v16 }
 0x197   : > { %v763_v19 = vmax.f32 %v740_v17, 0.0 }
 0x199   : > { %v773_v20 = vpack.c.bf16 %v763_v19, %v762_v18 }
 0x19b   : > { %877 = vmatmul.bf16.gmra.mxu3 %v773_v20 }
 0x19c   : > { %v742_v21 = vpop.f32.mrf.mxu2 }
 0x19d   : > { %v743_v22 = vadd.f32 %v1227_v10, %v742_v21 }
 0x19f   : > { %v764_v25 = vmax.f32 %v743_v22, 0.0 }
 0x1a4   : > { %v744_v23 = vpop.f32.mrf.mxu2 }
 0x1a5   : > { %v745_v24 = vadd.f32 %v1227_v10, %v744_v23 }
 0x1a7   : > { %v765_v26 = vmax.f32 %v745_v24, 0.0 }
 0x1a9   : > { %v774_v27 = vpack.c.bf16 %v765_v26, %v764_v25 }
 0x1ab   : > { %882 = vmatmul.bf16.gmra.mxu3 %v774_v27 }
 0x1ac   : > { %v747_v28 = vpop.f32.mrf.mxu2 }
 0x1ad   : > { %v748_v29 = vadd.f32 %v1227_v10, %v747_v28 }
 0x1af   : > { %v766_v32 = vmax.f32 %v748_v29, 0.0 }
 0x1b4   : > { %v749_v30 = vpop.f32.mrf.mxu2 }
 0x1b5   : > { %v750_v31 = vadd.f32 %v1227_v10, %v749_v30 }
 0x1b7   : > { %v767_v33 = vmax.f32 %v750_v31, 0.0 }
 0x1b9   : > { %v775_v34 = vpack.c.bf16 %v767_v33, %v766_v32 }
 0x1bb   : > { %887 = vmatmul.bf16.gmra.mxu3 %v775_v34 }
 0x1ce   : > { %v853_v36 = vpop.f32.mrf.mxu3 }
 0x1cf   : > { %v854_v37 = vadd.f32 %v1228_v35, %v853_v36 }
 0x1d1   : > { %893 = vst [vmem:[%s1455_s19] sm:$0xff] %v854_v37 }
 0x1d6   : > { %v855_v38 = vpop.f32.mrf.mxu3 }
 0x1d7   : > { %v856_v39 = vadd.f32 %v1228_v35, %v855_v38 }
 0x1d9   : > { %894 = vst [vmem:[%s1455_s19 + $0x8] sm:$0xff] %v856_v39 }
 0x1de   : > { %v858_v40 = vpop.f32.mrf.mxu3 }
 0x1df   : > { %v859_v41 = vadd.f32 %v1228_v35, %v858_v40 }
 0x1e1   : > { %895 = vst [vmem:[%s1455_s19 + $0x10] sm:$0xff] %v859_v41 }
 0x1e6   : > { %v860_v42 = vpop.f32.mrf.mxu3 }
 0x1e7   : > { %v861_v10 = vadd.f32 %v1228_v35, %v860_v42 }
 0x1e9   : > { %896 = vst [vmem:[%s1455_s19 + $0x18] sm:$0xff] %v861_v10 }
 0x1ee   : > { %v863_v43 = vpop.f32.mrf.mxu3 }
 0x1ef   : > { %v864_v44 = vadd.f32 %v1228_v35, %v863_v43 }
 0x1f1   : > { %897 = vst [vmem:[%s1455_s19 + $0x20] sm:$0xff] %v864_v44 }
 0x1f6   : > { %v865_v45 = vpop.f32.mrf.mxu3 }
 0x1f7   : > { %v866_v46 = vadd.f32 %v1228_v35, %v865_v45 }
 0x1f9   : > { %898 = vst [vmem:[%s1455_s19 + $0x28] sm:$0xff] %v866_v46 }
 0x1fe   : > { %v868_v47 = vpop.f32.mrf.mxu3 }
 0x1ff   : > { %v869_v48 = vadd.f32 %v1228_v35, %v868_v47 }
 0x201   : > { %899 = vst [vmem:[%s1455_s19 + $0x30] sm:$0xff] %v869_v48 }
 0x206   : > { %v870_v49 = vpop.f32.mrf.mxu3 }
 0x207   : > { %v871_v50 = vadd.f32 %v1228_v35, %v870_v49 }
 0x209   : > { %900 = vst [vmem:[%s1455_s19 + $0x38] sm:$0xff] %v871_v50 }
 0x20e   : > { %v873_v51 = vpop.f32.mrf.mxu3 }
 0x20f   : > { %v874_v52 = vadd.f32 %v1228_v35, %v873_v51 }
 0x211   : > { %901 = vst [vmem:[%s1455_s19 + $0x40] sm:$0xff] %v874_v52 }
 0x216   : > { %v875_v53 = vpop.f32.mrf.mxu3 }
 0x217   : > { %v876_v54 = vadd.f32 %v1228_v35, %v875_v53 }
 0x219   : > { %902 = vst [vmem:[%s1455_s19 + $0x48] sm:$0xff] %v876_v54 }
 0x21e   : > { %v878_v55 = vpop.f32.mrf.mxu3 }
 0x21f   : > { %v879_v56 = vadd.f32 %v1228_v35, %v878_v55 }
 0x221   : > { %903 = vst [vmem:[%s1455_s19 + $0x50] sm:$0xff] %v879_v56 }
 0x226   : > { %v880_v57 = vpop.f32.mrf.mxu3 }
 0x227   : > { %v881_v58 = vadd.f32 %v1228_v35, %v880_v57 }
 0x229   : > { %904 = vst [vmem:[%s1455_s19 + $0x58] sm:$0xff] %v881_v58 }
 0x22e   : > { %v883_v59 = vpop.f32.mrf.mxu3 }
 0x22f   : > { %v884_v60 = vadd.f32 %v1228_v35, %v883_v59 }
 0x231   : > { %905 = vst [vmem:[%s1455_s19 + $0x60] sm:$0xff] %v884_v60 }
 0x236   : > { %v885_v61 = vpop.f32.mrf.mxu3 }
 0x237   : > { %v886_v62 = vadd.f32 %v1228_v35, %v885_v61 }
 0x239   : > { %906 = vst [vmem:[%s1455_s19 + $0x68] sm:$0xff] %v886_v62 }
 0x23e   : > { %v888_v63 = vpop.f32.mrf.mxu3 }
 0x23f   : > { %v889_v0 = vadd.f32 %v1228_v35, %v888_v63 }
 0x241   : > { %907 = vst [vmem:[%s1455_s19 + $0x70] sm:$0xff] %v889_v0 }
 0x246   : > { %v890_v1 = vpop.f32.mrf.mxu3 }
 0x247   : > { %v891_v2 = vadd.f32 %v1228_v35, %v890_v1 }
 0x249   : > { %908 = vst [vmem:[%s1455_s19 + $0x78] sm:$0xff] %v891_v2 }
 0x24a PF: > { %s17_s24 = sadd.s32 1, %s1235_s24  }
 0x24b   : > { %p14_p4 = scmp.ge.s32.totalorder %s17_s24, 4  }
 0x24d   :  { %16 = sbr.rel (!%p14_p4) target bundleno = 1 (0x1), region = 78 }

</bundles_post_ra>
